<compile_context>
chip_gen: v5e
topology: v5e:2x2
jax: 0.10.0
libtpu: 0.0.40
codegen_flags: <defaults>
</compile_context>

<pallas_src>
import functools

import jax
import jax.numpy as jnp
from jax.experimental import pallas as pl
from jax.experimental.pallas import tpu as pltpu


_VMEM = pl.BlockSpec(memory_space=pltpu.MemorySpace.VMEM)


# ----------------------------- Pallas kernels -----------------------------

def _matmul_bias_lrelu_kernel(x_ref, w_ref, b_ref, o_ref):
    # y = LeakyReLU_0.2(x @ w + b)  -- MXU matmul + VPU bias/activation, fused.
    y = jnp.dot(x_ref[...], w_ref[...], preferred_element_type=jnp.float32)
    y = y + b_ref[...]
    o_ref[...] = jnp.where(y > 0, y, 0.2 * y)


def _vae_head_kernel(x_ref, w_enc_ref, w_z_ref, w_h_ref, eps_ref, w_d1_ref, w_d2_ref,
                     b_ref, heads_ref, zpost_ref, recon_ref, *, z_dim):
    """Fused: enc_fc -> z_mlp -> [z_mean|z_logvar] -> reparameterize -> decoder MLP."""

    def leaky(v):
        return jnp.where(v > 0, v, 0.2 * v)

    # encoder FC: flattened conv features -> cnn_output_dim (bf16 MXU, f32 accumulate)
    x16 = x_ref[...].astype(jnp.bfloat16)
    h = jnp.dot(x16, w_enc_ref[...], preferred_element_type=jnp.float32)
    h = leaky(h + b_ref[0:1, 0:h.shape[1]])

    # z_mlp: LinearUnit(cnn_output_dim, hidden_dim, batchnorm=False) = Linear + LeakyReLU(0.2)
    oz = jnp.dot(h, w_z_ref[...], preferred_element_type=jnp.float32)
    oz = leaky(oz + b_ref[1:2, 0:oz.shape[1]])

    # Concatenated heads: one wide matmul producing [z_mean | z_logvar].
    # LinearUnit(..., False) applies LeakyReLU(0.2) to both heads (as in the reference).
    hd = jnp.dot(oz, w_h_ref[...], preferred_element_type=jnp.float32)
    hd = leaky(hd + b_ref[2:3, 0:hd.shape[1]])
    heads_ref[...] = hd

    z_mean = hd[:, :z_dim]
    z_logvar = hd[:, z_dim:]

    # reparameterize: z = mean + eps * exp(0.5 * logvar)  (exp on the EUP, ~free)
    z = z_mean + eps_ref[...] * jnp.exp(0.5 * z_logvar)
    zpost_ref[...] = z

    # Decoder MLP: Linear+LeakyReLU, then Linear+sigmoid back to frame_stack*size*size.
    d1 = jnp.dot(z, w_d1_ref[...], preferred_element_type=jnp.float32)
    d1 = leaky(d1 + b_ref[3:4, 0:d1.shape[1]])
    r = jnp.dot(d1.astype(jnp.bfloat16), w_d2_ref[...], preferred_element_type=jnp.float32)
    r = r + b_ref[4:5, 0:r.shape[1]]
    recon_ref[...] = 1.0 / (1.0 + jnp.exp(-r))


# ----------------------------- wrappers ------------------------------------

def im2col_nhwc(x, k=3, s=2, p=1):
    """x: [B, H, W, C] -> patches [B*Ho*Wo, k*k*C] (feature order = (kh, kw, c))."""
    B, H, W, C = x.shape
    xp = jnp.pad(x, ((0, 0), (p, p), (p, p), (0, 0)))
    Ho = (H + 2 * p - k) // s + 1
    Wo = (W + 2 * p - k) // s + 1
    cols = []
    for i in range(k):
        for j in range(k):
            cols.append(xp[:, i:i + s * Ho:s, j:j + s * Wo:s, :])   # [B, Ho, Wo, C]
    patches = jnp.stack(cols, axis=3)                               # [B, Ho, Wo, k*k, C]
    return patches.reshape(B * Ho * Wo, k * k * C), Ho, Wo


def conv2d_lrelu(x_nhwc, w, b):
    """3x3 / stride-2 / pad-1 conv + LeakyReLU(0.2); NHWC in -> NHWC out (no transposes)."""
    B = x_nhwc.shape[0]
    patches, Ho, Wo = im2col_nhwc(x_nhwc)
    Cout = w.shape[1]
    y = pl.pallas_call(
        _matmul_bias_lrelu_kernel,
        out_shape=jax.ShapeDtypeStruct((patches.shape[0], Cout), jnp.float32),
        in_specs=[_VMEM, _VMEM, _VMEM],
        out_specs=_VMEM,
    )(patches, w, b)
    return y.reshape(B, Ho, Wo, Cout)          # free row-major view


def vae_head(x_flat, eps, p):
    """Single fused pallas_call for everything after the conv flatten."""
    B = x_flat.shape[0]
    two_z = p["w_heads"].shape[1]
    z_dim = two_z // 2
    n_out = p["w_dec2"].shape[1]
    kernel = functools.partial(_vae_head_kernel, z_dim=z_dim)
    heads, z_post, recon = pl.pallas_call(
        kernel,
        out_shape=(
            jax.ShapeDtypeStruct((B, two_z), jnp.float32),   # [z_mean | z_logvar]
            jax.ShapeDtypeStruct((B, z_dim), jnp.float32),   # z_post
            jax.ShapeDtypeStruct((B, n_out), jnp.float32),   # recon (flat)
        ),
        in_specs=[_VMEM] * 8,
        out_specs=(_VMEM, _VMEM, _VMEM),
    )(x_flat, p["w_enc"], p["w_zmlp"], p["w_heads"], eps,
      p["w_dec1"], p["w_dec2"], p["biases"])
    return heads, z_post, recon


# ----------------------------- model ---------------------------------------

def init_params(key, frame_stack, size, cnn_output_dim, hidden_dim, z_dim):
    ks = jax.random.split(key, 8)

    def lin(k, fan_in, fan_out):
        scale = 1.0 / jnp.sqrt(jnp.float32(fan_in))
        kw, kb = jax.random.split(k)
        w = jax.random.uniform(kw, (fan_in, fan_out), jnp.float32, -scale, scale)
        b = jax.random.uniform(kb, (fan_out,), jnp.float32, -scale, scale)
        return w, b

    c1, c2 = 32, 64
    flat = c2 * (size // 4) * (size // 4)

    w_c1, b_c1 = lin(ks[0], frame_stack * 9, c1)
    w_c2, b_c2 = lin(ks[1], c1 * 9, c2)
    w_enc, b_enc = lin(ks[2], flat, cnn_output_dim)
    w_zmlp, b_zmlp = lin(ks[3], cnn_output_dim, hidden_dim)
    w_mean, b_mean = lin(ks[4], hidden_dim, z_dim)
    w_lv, b_lv = lin(ks[5], hidden_dim, z_dim)
    w_d1, b_d1 = lin(ks[6], z_dim, hidden_dim)
    w_d2, b_d2 = lin(ks[7], hidden_dim, frame_stack * size * size)

    # Concatenate z_mean / z_logvar into one wide head matmul: [mean | logvar].
    w_heads = jnp.concatenate([w_mean, w_lv], axis=1)
    b_heads = jnp.concatenate([b_mean, b_lv], axis=0)

    # Pack all post-conv biases into a single VMEM buffer (one DMA, one BlockSpec).
    bias_rows = [b_enc, b_zmlp, b_heads, b_d1, b_d2]
    width = max(b.shape[0] for b in bias_rows)
    biases = jnp.stack([jnp.pad(b, (0, width - b.shape[0])) for b in bias_rows], axis=0)

    return dict(
        conv1_w=w_c1, conv1_b=b_c1.reshape(1, -1),
        conv2_w=w_c2, conv2_b=b_c2.reshape(1, -1),
        w_enc=w_enc.astype(jnp.bfloat16),         # large weight: bf16 operand, f32 acc
        w_zmlp=w_zmlp,
        w_heads=w_heads,
        w_dec1=w_d1,
        w_dec2=w_d2.astype(jnp.bfloat16),         # large weight: bf16 operand, f32 acc
        biases=biases,
    )


def behavior_vae_forward(params, x, eps):
    """Mirrors Behavior_VAE.forward: returns (z_mean, z_logvar, z_post, recon_x)."""
    B, C, H, W = x.shape
    zd = eps.shape[1]

    # Single layout change at the boundary; the conv path is NHWC end-to-end.
    x_nhwc = jnp.transpose(x, (0, 2, 3, 1))

    # Encoder: 2x strided conv + LeakyReLU(0.2)
    h = conv2d_lrelu(x_nhwc, params["conv1_w"], params["conv1_b"])   # [B, H/2, W/2, 32]
    h = conv2d_lrelu(h, params["conv2_w"], params["conv2_b"])        # [B, H/4, W/4, 64]
    h_flat = h.reshape(B, -1)                                        # free row-major view

    # Fused: enc_fc -> z_mlp -> heads -> reparameterize -> decoder (one pallas_call).
    # TODO(synk): original Encoder/Decoder class bodies not provided; encoder FC +
    # MLP decoder (Linear+LeakyReLU, Linear+sigmoid) approximate them.
    heads, z_post, recon = vae_head(h_flat, eps, params)

    z_mean = heads[:, :zd]
    z_logvar = heads[:, zd:]
    recon_x = recon.reshape(B, C, H, W)
    # TODO(synk): when batch grows, add a batch grid axis marked parallel (v7x 2-TC sharding).
    return z_mean, z_logvar, z_post, recon_x


if __name__ == "__main__":
    # Config (small, consistent with the module's cfg fields)
    batch, frame_stack, size = 2, 4, 16
    z_dim, cnn_output_dim, hidden_dim = 16, 64, 32

    key = jax.random.PRNGKey(0)
    k_param, k_x, k_eps = jax.random.split(key, 3)

    params = init_params(k_param, frame_stack, size, cnn_output_dim, hidden_dim, z_dim)
    x = jax.random.normal(k_x, (batch, frame_stack, size, size), jnp.float32)
    # eps stands in (deterministically) for torch.randn_like in reparameterize.
    eps = jax.random.normal(k_eps, (batch, z_dim), jnp.float32)

    fwd = jax.jit(behavior_vae_forward)
    z_mean, z_logvar, z_post, recon_x = fwd(params, x, eps)
    jax.block_until_ready((z_mean, z_logvar, z_post, recon_x))

    assert z_mean.shape == (batch, z_dim)
    assert z_logvar.shape == (batch, z_dim)
    assert z_post.shape == (batch, z_dim)
    assert recon_x.shape == (batch, frame_stack, size, size)
    assert bool(jnp.all(jnp.isfinite(recon_x)))
    print("KERNEL_OK")
</pallas_src>

<mosaic_0001>
module attributes {stable_mosaic.version = 11 : i64} {
  func.func @_matmul_bias_lrelu_kernel(%arg0: memref<128x36xf32, #tpu.memory_space<vmem>>, %arg1: memref<36x32xf32, #tpu.memory_space<vmem>>, %arg2: memref<1x32xf32, #tpu.memory_space<vmem>>, %arg3: memref<128x32xf32, #tpu.memory_space<vmem>>) attributes {dimension_semantics = [], scalar_prefetch = 0 : i64, scratch_operands = 0 : i64, tpu.core_type = #tpu.core_type<tc>} {
    %c0 = arith.constant 0 : index
    %c0_0 = arith.constant 0 : index
    %0 = vector.load %arg0[%c0, %c0_0] : memref<128x36xf32, #tpu.memory_space<vmem>>, vector<128x36xf32>
    %c0_1 = arith.constant 0 : index
    %c0_2 = arith.constant 0 : index
    %1 = vector.load %arg1[%c0_1, %c0_2] : memref<36x32xf32, #tpu.memory_space<vmem>>, vector<36x32xf32>
    %cst = arith.constant dense<0.000000e+00> : vector<128x32xf32>
    %2 = tpu.matmul %0, %1, %cst {dimension_numbers = #tpu.dot_dimension_numbers<[1], [0], [0], [1], [0, 0, 1, 1], [], []>} : vector<128x36xf32>, vector<36x32xf32>, vector<128x32xf32> -> vector<128x32xf32>
    %c0_3 = arith.constant 0 : index
    %c0_4 = arith.constant 0 : index
    %3 = vector.load %arg2[%c0_3, %c0_4] : memref<1x32xf32, #tpu.memory_space<vmem>>, vector<1x32xf32>
    %4 = vector.broadcast %3 : vector<1x32xf32> to vector<128x32xf32>
    %5 = arith.addf %2, %4 : vector<128x32xf32>
    %cst_5 = arith.constant 0.000000e+00 : f32
    %6 = vector.broadcast %cst_5 : f32 to vector<128x32xf32>
    %7 = arith.cmpf ogt, %5, %6 : vector<128x32xf32>
    %cst_6 = arith.constant 2.000000e-01 : f32
    %8 = vector.broadcast %cst_6 : f32 to vector<128x32xf32>
    %9 = arith.mulf %8, %5 : vector<128x32xf32>
    %10 = arith.select %7, %5, %9 : vector<128x32xi1>, vector<128x32xf32>
    %c0_7 = arith.constant 0 : index
    %c0_8 = arith.constant 0 : index
    %11 = vector.load %arg3[%c0_7, %c0_8] : memref<128x32xf32, #tpu.memory_space<vmem>>, vector<128x32xf32>
    tpu.vector_store %arg3[%c0_7, %c0_8], %10 {strides = array<i32>} : memref<128x32xf32, #tpu.memory_space<vmem>>, vector<128x32xf32>,
    return
  }
}

module attributes {stable_mosaic.version = 11 : i64} {
  func.func @_matmul_bias_lrelu_kernel(%arg0: memref<32x288xf32, #tpu.memory_space<vmem>>, %arg1: memref<288x64xf32, #tpu.memory_space<vmem>>, %arg2: memref<1x64xf32, #tpu.memory_space<vmem>>, %arg3: memref<32x64xf32, #tpu.memory_space<vmem>>) attributes {dimension_semantics = [], scalar_prefetch = 0 : i64, scratch_operands = 0 : i64, tpu.core_type = #tpu.core_type<tc>} {
    %c0 = arith.constant 0 : index
    %c0_0 = arith.constant 0 : index
    %0 = vector.load %arg0[%c0, %c0_0] : memref<32x288xf32, #tpu.memory_space<vmem>>, vector<32x288xf32>
    %c0_1 = arith.constant 0 : index
    %c0_2 = arith.constant 0 : index
    %1 = vector.load %arg1[%c0_1, %c0_2] : memref<288x64xf32, #tpu.memory_space<vmem>>, vector<288x64xf32>
    %cst = arith.constant dense<0.000000e+00> : vector<32x64xf32>
    %2 = tpu.matmul %0, %1, %cst {dimension_numbers = #tpu.dot_dimension_numbers<[1], [0], [0], [1], [0, 0, 1, 1], [], []>} : vector<32x288xf32>, vector<288x64xf32>, vector<32x64xf32> -> vector<32x64xf32>
    %c0_3 = arith.constant 0 : index
    %c0_4 = arith.constant 0 : index
    %3 = vector.load %arg2[%c0_3, %c0_4] : memref<1x64xf32, #tpu.memory_space<vmem>>, vector<1x64xf32>
    %4 = vector.broadcast %3 : vector<1x64xf32> to vector<32x64xf32>
    %5 = arith.addf %2, %4 : vector<32x64xf32>
    %cst_5 = arith.constant 0.000000e+00 : f32
    %6 = vector.broadcast %cst_5 : f32 to vector<32x64xf32>
    %7 = arith.cmpf ogt, %5, %6 : vector<32x64xf32>
    %cst_6 = arith.constant 2.000000e-01 : f32
    %8 = vector.broadcast %cst_6 : f32 to vector<32x64xf32>
    %9 = arith.mulf %8, %5 : vector<32x64xf32>
    %10 = arith.select %7, %5, %9 : vector<32x64xi1>, vector<32x64xf32>
    %c0_7 = arith.constant 0 : index
    %c0_8 = arith.constant 0 : index
    %11 = vector.load %arg3[%c0_7, %c0_8] : memref<32x64xf32, #tpu.memory_space<vmem>>, vector<32x64xf32>
    tpu.vector_store %arg3[%c0_7, %c0_8], %10 {strides = array<i32>} : memref<32x64xf32, #tpu.memory_space<vmem>>, vector<32x64xf32>,
    return
  }
}

module attributes {stable_mosaic.version = 11 : i64} {
  func.func @_vae_head_kernel(%arg0: memref<2x1024xf32, #tpu.memory_space<vmem>>, %arg1: memref<1024x64xbf16, #tpu.memory_space<vmem>>, %arg2: memref<64x32xf32, #tpu.memory_space<vmem>>, %arg3: memref<32x32xf32, #tpu.memory_space<vmem>>, %arg4: memref<2x16xf32, #tpu.memory_space<vmem>>, %arg5: memref<16x32xf32, #tpu.memory_space<vmem>>, %arg6: memref<32x1024xbf16, #tpu.memory_space<vmem>>, %arg7: memref<5x1024xf32, #tpu.memory_space<vmem>>, %arg8: memref<2x32xf32, #tpu.memory_space<vmem>>, %arg9: memref<2x16xf32, #tpu.memory_space<vmem>>, %arg10: memref<2x1024xf32, #tpu.memory_space<vmem>>) attributes {dimension_semantics = [], scalar_prefetch = 0 : i64, scratch_operands = 0 : i64, tpu.core_type = #tpu.core_type<tc>} {
    %c0 = arith.constant 0 : index
    %c0_0 = arith.constant 0 : index
    %0 = vector.load %arg0[%c0, %c0_0] : memref<2x1024xf32, #tpu.memory_space<vmem>>, vector<2x1024xf32>
    %1 = arith.truncf %0 : vector<2x1024xf32> to vector<2x1024xbf16>
    %c0_1 = arith.constant 0 : index
    %c0_2 = arith.constant 0 : index
    %2 = vector.load %arg1[%c0_1, %c0_2] : memref<1024x64xbf16, #tpu.memory_space<vmem>>, vector<1024x64xbf16>
    %cst = arith.constant dense<0.000000e+00> : vector<2x64xf32>
    %3 = tpu.matmul %1, %2, %cst {dimension_numbers = #tpu.dot_dimension_numbers<[1], [0], [0], [1], [0, 0, 1, 1], [], []>} : vector<2x1024xbf16>, vector<1024x64xbf16>, vector<2x64xf32> -> vector<2x64xf32>
    %c0_3 = arith.constant 0 : index
    %c0_4 = arith.constant 0 : index
    %4 = vector.load %arg7[%c0_3, %c0_4] : memref<5x1024xf32, #tpu.memory_space<vmem>>, vector<1x64xf32>
    %5 = vector.broadcast %4 : vector<1x64xf32> to vector<2x64xf32>
    %6 = arith.addf %3, %5 : vector<2x64xf32>
    %cst_5 = arith.constant 0.000000e+00 : f32
    %7 = vector.broadcast %cst_5 : f32 to vector<2x64xf32>
    %8 = arith.cmpf ogt, %6, %7 : vector<2x64xf32>
    %cst_6 = arith.constant 2.000000e-01 : f32
    %9 = vector.broadcast %cst_6 : f32 to vector<2x64xf32>
    %10 = arith.mulf %9, %6 : vector<2x64xf32>
    %11 = arith.select %8, %6, %10 : vector<2x64xi1>, vector<2x64xf32>
    %c0_7 = arith.constant 0 : index
    %c0_8 = arith.constant 0 : index
    %12 = vector.load %arg2[%c0_7, %c0_8] : memref<64x32xf32, #tpu.memory_space<vmem>>, vector<64x32xf32>
    %cst_9 = arith.constant dense<0.000000e+00> : vector<2x32xf32>
    %13 = tpu.matmul %11, %12, %cst_9 {dimension_numbers = #tpu.dot_dimension_numbers<[1], [0], [0], [1], [0, 0, 1, 1], [], []>} : vector<2x64xf32>, vector<64x32xf32>, vector<2x32xf32> -> vector<2x32xf32>
    %c1 = arith.constant 1 : index
    %c0_10 = arith.constant 0 : index
    %14 = vector.load %arg7[%c1, %c0_10] : memref<5x1024xf32, #tpu.memory_space<vmem>>, vector<1x32xf32>
    %15 = vector.broadcast %14 : vector<1x32xf32> to vector<2x32xf32>
    %16 = arith.addf %13, %15 : vector<2x32xf32>
    %cst_11 = arith.constant 0.000000e+00 : f32
    %17 = vector.broadcast %cst_11 : f32 to vector<2x32xf32>
    %18 = arith.cmpf ogt, %16, %17 : vector<2x32xf32>
    %cst_12 = arith.constant 2.000000e-01 : f32
    %19 = vector.broadcast %cst_12 : f32 to vector<2x32xf32>
    %20 = arith.mulf %19, %16 : vector<2x32xf32>
    %21 = arith.select %18, %16, %20 : vector<2x32xi1>, vector<2x32xf32>
    %c0_13 = arith.constant 0 : index
    %c0_14 = arith.constant 0 : index
    %22 = vector.load %arg3[%c0_13, %c0_14] : memref<32x32xf32, #tpu.memory_space<vmem>>, vector<32x32xf32>
    %cst_15 = arith.constant dense<0.000000e+00> : vector<2x32xf32>
    %23 = tpu.matmul %21, %22, %cst_15 {dimension_numbers = #tpu.dot_dimension_numbers<[1], [0], [0], [1], [0, 0, 1, 1], [], []>} : vector<2x32xf32>, vector<32x32xf32>, vector<2x32xf32> -> vector<2x32xf32>
    %c2 = arith.constant 2 : index
    %c0_16 = arith.constant 0 : index
    %24 = vector.load %arg7[%c2, %c0_16] : memref<5x1024xf32, #tpu.memory_space<vmem>>, vector<1x32xf32>
    %25 = vector.broadcast %24 : vector<1x32xf32> to vector<2x32xf32>
    %26 = arith.addf %23, %25 : vector<2x32xf32>
    %cst_17 = arith.constant 0.000000e+00 : f32
    %27 = vector.broadcast %cst_17 : f32 to vector<2x32xf32>
    %28 = arith.cmpf ogt, %26, %27 : vector<2x32xf32>
    %cst_18 = arith.constant 2.000000e-01 : f32
    %29 = vector.broadcast %cst_18 : f32 to vector<2x32xf32>
    %30 = arith.mulf %29, %26 : vector<2x32xf32>
    %31 = arith.select %28, %26, %30 : vector<2x32xi1>, vector<2x32xf32>
    %c0_19 = arith.constant 0 : index
    %c0_20 = arith.constant 0 : index
    %32 = vector.load %arg8[%c0_19, %c0_20] : memref<2x32xf32, #tpu.memory_space<vmem>>, vector<2x32xf32>
    tpu.vector_store %arg8[%c0_19, %c0_20], %31 {strides = array<i32>} : memref<2x32xf32, #tpu.memory_space<vmem>>, vector<2x32xf32>,
    %33 = vector.extract_strided_slice %31 {offsets = [0, 0], sizes = [2, 16], strides = [1, 1]} : vector<2x32xf32> to vector<2x16xf32>
    %34 = vector.extract_strided_slice %31 {offsets = [0, 16], sizes = [2, 16], strides = [1, 1]} : vector<2x32xf32> to vector<2x16xf32>
    %c0_21 = arith.constant 0 : index
    %c0_22 = arith.constant 0 : index
    %35 = vector.load %arg4[%c0_21, %c0_22] : memref<2x16xf32, #tpu.memory_space<vmem>>, vector<2x16xf32>
    %cst_23 = arith.constant 5.000000e-01 : f32
    %36 = vector.broadcast %cst_23 : f32 to vector<2x16xf32>
    %37 = arith.mulf %36, %34 : vector<2x16xf32>
    %38 = math.exp %37 : vector<2x16xf32>
    %39 = arith.mulf %35, %38 : vector<2x16xf32>
    %40 = arith.addf %33, %39 : vector<2x16xf32>
    %c0_24 = arith.constant 0 : index
    %c0_25 = arith.constant 0 : index
    %41 = vector.load %arg9[%c0_24, %c0_25] : memref<2x16xf32, #tpu.memory_space<vmem>>, vector<2x16xf32>
    tpu.vector_store %arg9[%c0_24, %c0_25], %40 {strides = array<i32>} : memref<2x16xf32, #tpu.memory_space<vmem>>, vector<2x16xf32>,
    %c0_26 = arith.constant 0 : index
    %c0_27 = arith.constant 0 : index
    %42 = vector.load %arg5[%c0_26, %c0_27] : memref<16x32xf32, #tpu.memory_space<vmem>>, vector<16x32xf32>
    %cst_28 = arith.constant dense<0.000000e+00> : vector<2x32xf32>
    %43 = tpu.matmul %40, %42, %cst_28 {dimension_numbers = #tpu.dot_dimension_numbers<[1], [0], [0], [1], [0, 0, 1, 1], [], []>} : vector<2x16xf32>, vector<16x32xf32>, vector<2x32xf32> -> vector<2x32xf32>
    %c3 = arith.constant 3 : index
    %c0_29 = arith.constant 0 : index
    %44 = vector.load %arg7[%c3, %c0_29] : memref<5x1024xf32, #tpu.memory_space<vmem>>, vector<1x32xf32>
    %45 = vector.broadcast %44 : vector<1x32xf32> to vector<2x32xf32>
    %46 = arith.addf %43, %45 : vector<2x32xf32>
    %cst_30 = arith.constant 0.000000e+00 : f32
    %47 = vector.broadcast %cst_30 : f32 to vector<2x32xf32>
    %48 = arith.cmpf ogt, %46, %47 : vector<2x32xf32>
    %cst_31 = arith.constant 2.000000e-01 : f32
    %49 = vector.broadcast %cst_31 : f32 to vector<2x32xf32>
    %50 = arith.mulf %49, %46 : vector<2x32xf32>
    %51 = arith.select %48, %46, %50 : vector<2x32xi1>, vector<2x32xf32>
    %52 = arith.truncf %51 : vector<2x32xf32> to vector<2x32xbf16>
    %c0_32 = arith.constant 0 : index
    %c0_33 = arith.constant 0 : index
    %53 = vector.load %arg6[%c0_32, %c0_33] : memref<32x1024xbf16, #tpu.memory_space<vmem>>, vector<32x1024xbf16>
    %cst_34 = arith.constant dense<0.000000e+00> : vector<2x1024xf32>
    %54 = tpu.matmul %52, %53, %cst_34 {dimension_numbers = #tpu.dot_dimension_numbers<[1], [0], [0], [1], [0, 0, 1, 1], [], []>} : vector<2x32xbf16>, vector<32x1024xbf16>, vector<2x1024xf32> -> vector<2x1024xf32>
    %c4 = arith.constant 4 : index
    %c0_35 = arith.constant 0 : index
    %55 = vector.load %arg7[%c4, %c0_35] : memref<5x1024xf32, #tpu.memory_space<vmem>>, vector<1x1024xf32>
    %56 = vector.broadcast %55 : vector<1x1024xf32> to vector<2x1024xf32>
    %57 = arith.addf %54, %56 : vector<2x1024xf32>
    %cst_36 = arith.constant 0.000000e+00 : f32
    %58 = vector.broadcast %cst_36 : f32 to vector<2x1024xf32>
    %59 = arith.subf %58, %57 : vector<2x1024xf32>
    %60 = math.exp %59 : vector<2x1024xf32>
    %cst_37 = arith.constant 1.000000e+00 : f32
    %61 = vector.broadcast %cst_37 : f32 to vector<2x1024xf32>
    %62 = arith.addf %61, %60 : vector<2x1024xf32>
    %cst_38 = arith.constant 1.000000e+00 : f32
    %63 = vector.broadcast %cst_38 : f32 to vector<2x1024xf32>
    %64 = arith.divf %63, %62 : vector<2x1024xf32>
    %c0_39 = arith.constant 0 : index
    %c0_40 = arith.constant 0 : index
    %65 = vector.load %arg10[%c0_39, %c0_40] : memref<2x1024xf32, #tpu.memory_space<vmem>>, vector<2x1024xf32>
    tpu.vector_store %arg10[%c0_39, %c0_40], %64 {strides = array<i32>} : memref<2x1024xf32, #tpu.memory_space<vmem>>, vector<2x1024xf32>,
    return
  }
}

</mosaic_0001>

<bundles_post_ra>
// kernel: behavior_vae_forward.3
= control target key start
LH: loop header
LB: loop body
LE: loop exit
PB: predicated region body
PF: predicated region fallthrough
CT: control target
= control target key end

     0   :  { %vm88_vm0 = vcmask 1043456   ;;  %vm39_vm1 = vcmask 293888   ;;  %vm205_vm2 = vcmask 261120   ;;  %s443_s1 = inlined_call_operand.vmem [shape: f32[36,32], index: 1, kind: input, shape index: {}]   ;;  %s444_s0 = inlined_call_operand.vmem [shape: f32[128,36], index: 0, kind: input, shape index: {}]   ;;  %s445_s2 = inlined_call_operand.vmem [shape: f32[1,32], index: 2, kind: input, shape index: {}]   ;;  %s446_s3 = inlined_call_operand.vmem [shape: f32[128,32], index: 3, kind: output, shape index: {}]  }
   0x1   :  { %v34_v0 = vld [vmem:[%s443_s1 + $0x20] sm:$0xf]  ;;  %v33_v1 = vld [vmem:[%s443_s1 + $0x18] sm:$0xff]  ;;  %v32_v2 = vld [vmem:[%s443_s1 + $0x10] sm:$0xff] }
   0x2   :  { %244 = vmatpush.msk.msra.mxu2 %vm88_vm0, %v34_v0  ;;  %245 = vmatpush.msk.msra.mxu3 %vm88_vm0, %v34_v0  ;;  %v31_v3 = vld [vmem:[%s443_s1 + $0x8] sm:$0xff]  ;;  %v30_v4 = vld [vmem:[%s443_s1] sm:$0xff]  ;;  %v24_v13 = vld [vmem:[%s444_s0 + $0x50] sm:$0xff] }
   0x3   :  { %226 = vmatpush.msk.msra.mxu0 %vm88_vm0, %v34_v0  ;;  %243 = vmatpush.msk.msra.mxu1 %vm88_vm0, %v34_v0  ;;  %v22_v5 = vld [vmem:[%s444_s0 + $0x40] sm:$0xff]  ;;  %v23_v9 = vld [vmem:[%s444_s0 + $0x48] sm:$0xff]  ;;  %v28_v14 = vld [vmem:[%s444_s0 + $0x70] sm:$0xff] }
   0x4   :  { %247 = vmatpush.msra.mxu2 %v33_v1  ;;  %248 = vmatpush.msra.mxu3 %v33_v1  ;;  %v26_v6 = vld [vmem:[%s444_s0 + $0x60] sm:$0xff]  ;;  %v27_v10 = vld [vmem:[%s444_s0 + $0x68] sm:$0xff]  ;;  %v16_v15 = vld [vmem:[%s444_s0 + $0x10] sm:$0xff] }
   0x5   :  { %104 = vmatpush.msra.mxu0 %v33_v1  ;;  %246 = vmatpush.msra.mxu1 %v33_v1  ;;  %v14_v7 = vld [vmem:[%s444_s0] sm:$0xff]  ;;  %v15_v11 = vld [vmem:[%s444_s0 + $0x8] sm:$0xff]  ;;  %v20_v16 = vld [vmem:[%s444_s0 + $0x30] sm:$0xff] }
   0x6   :  { %250 = vmatpush.msra.mxu2 %v32_v2  ;;  %251 = vmatpush.msra.mxu3 %v32_v2  ;;  %v18_v8 = vld [vmem:[%s444_s0 + $0x20] sm:$0xff]  ;;  %v19_v12 = vld [vmem:[%s444_s0 + $0x28] sm:$0xff]  ;;  %v25_v17 = vld [vmem:[%s444_s0 + $0x58] sm:$0xff] }
   0x7   :  { %105 = vmatpush.msra.mxu0 %v32_v2  ;;  %249 = vmatpush.msra.mxu1 %v32_v2  ;;  %v29_v18 = vld [vmem:[%s444_s0 + $0x78] sm:$0xff]  ;;  %v361_v21 = vld [vmem:[%s445_s2] ss:$0 sm:$0xff] }
   0x8   :  { %253 = vmatpush.msra.mxu2 %v31_v3  ;;  %254 = vmatpush.msra.mxu3 %v31_v3  ;;  %v17_v19 = vld [vmem:[%s444_s0 + $0x18] sm:$0xff] }
   0x9   :  { %106 = vmatpush.msra.mxu0 %v31_v3  ;;  %252 = vmatpush.msra.mxu1 %v31_v3  ;;  %v21_v20 = vld [vmem:[%s444_s0 + $0x38] sm:$0xff] }
   0xa   :  { %256 = vmatpush.msra.mxu2 %v30_v4  ;;  %257 = vmatpush.msra.mxu3 %v30_v4 }
   0xb   :  { %235 = vmatmul.msk.f32.vlgmr.msra.gmra.mxu2 %vm39_vm1, %v22_v5  ;;  %239 = vmatmul.msk.f32.vlgmr.msra.gmra.mxu3 %vm39_vm1, %v26_v6 }
   0xc   :  { %107 = vmatpush.msra.mxu0 %v30_v4  ;;  %255 = vmatpush.msra.mxu1 %v30_v4 }
   0xd   :  { %227 = vmatmul.msk.f32.vlgmr.msra.gmra.mxu0 %vm39_vm1, %v14_v7  ;;  %231 = vmatmul.msk.f32.vlgmr.msra.gmra.mxu1 %vm39_vm1, %v18_v8 }
  0x13   :  { %236 = vmatmul.msk.f32.gmra.mxu2 %vm39_vm1, %v23_v9  ;;  %240 = vmatmul.msk.f32.gmra.mxu3 %vm39_vm1, %v27_v10 }
  0x15   :  { %228 = vmatmul.msk.f32.gmra.mxu0 %vm39_vm1, %v15_v11  ;;  %232 = vmatmul.msk.f32.gmra.mxu1 %vm39_vm1, %v19_v12 }
  0x1b   :  { %237 = vmatmul.msk.f32.gmra.mxu2 %vm39_vm1, %v24_v13  ;;  %241 = vmatmul.msk.f32.gmra.mxu3 %vm39_vm1, %v28_v14 }
  0x1d   :  { %229 = vmatmul.msk.f32.gmra.mxu0 %vm39_vm1, %v16_v15  ;;  %233 = vmatmul.msk.f32.gmra.mxu1 %vm39_vm1, %v20_v16 }
  0x23   :  { %238 = vmatmul.msk.f32.gmra.mxu2 %vm39_vm1, %v25_v17  ;;  %242 = vmatmul.msk.f32.gmra.mxu3 %vm39_vm1, %v29_v18 }
  0x25   :  { %230 = vmatmul.msk.f32.gmra.mxu0 %vm39_vm1, %v17_v19  ;;  %234 = vmatmul.msk.f32.gmra.mxu1 %vm39_vm1, %v21_v20 }
  0x8a   :  { %v109_v22 = vpop.f32.mrf.mxu0  ;;  %v121_v23 = vpop.f32.mrf.mxu1 }
  0x8b   :  { %v110_v24 = vadd.f32 %v361_v21, %v109_v22  ;;  %v122_v25 = vadd.f32 %v361_v21, %v121_v23 }
  0x8d   :  { %vm157_vm3 = vcmp.gt.f32.partialorder %v110_v24, 0.0  ;;  %v173_v26 = vmul.f32 0.2, %v110_v24  ;;  %vm161_vm4 = vcmp.gt.f32.partialorder %v122_v25, 0.0  ;;  %v177_v27 = vmul.f32 0.2, %v122_v25 }
  0x8e   :  { %v133_v28 = vpop.f32.mrf.mxu2  ;;  %v145_v29 = vpop.f32.mrf.mxu3 }
  0x8f   :  { %v189_v30 = vsel %vm157_vm3, %v110_v24, %v173_v26  ;;  %v193_v31 = vsel %vm161_vm4, %v122_v25, %v177_v27  ;;  %v134_v32 = vadd.f32 %v361_v21, %v133_v28  ;;  %v146_v33 = vadd.f32 %v361_v21, %v145_v29 }
  0x90   :  { %206 = vst.msk [vmem:[%s446_s3] sm:$0xff] %vm205_vm2, %v189_v30 }
  0x91   :  { %210 = vst.msk [vmem:[%s446_s3 + $0x20] sm:$0xff] %vm205_vm2, %v193_v31  ;;  %vm165_vm5 = vcmp.gt.f32.partialorder %v134_v32, 0.0  ;;  %v181_v34 = vmul.f32 0.2, %v134_v32  ;;  %vm169_vm6 = vcmp.gt.f32.partialorder %v146_v33, 0.0 }
  0x92   :  { %v185_v35 = vmul.f32 0.2, %v146_v33  ;;  %v112_v36 = vpop.f32.mrf.mxu0  ;;  %v124_v37 = vpop.f32.mrf.mxu1 }
  0x93   :  { %v197_v38 = vsel %vm165_vm5, %v134_v32, %v181_v34  ;;  %v113_v39 = vadd.f32 %v361_v21, %v112_v36  ;;  %v125_v40 = vadd.f32 %v361_v21, %v124_v37 }
  0x94   :  { %214 = vst.msk [vmem:[%s446_s3 + $0x40] sm:$0xff] %vm205_vm2, %v197_v38  ;;  %v201_v41 = vsel %vm169_vm6, %v146_v33, %v185_v35 }
  0x95   :  { %218 = vst.msk [vmem:[%s446_s3 + $0x60] sm:$0xff] %vm205_vm2, %v201_v41  ;;  %vm158_vm7 = vcmp.gt.f32.partialorder %v113_v39, 0.0  ;;  %v174_v42 = vmul.f32 0.2, %v113_v39  ;;  %vm162_vm8 = vcmp.gt.f32.partialorder %v125_v40, 0.0 }
  0x96   :  { %v178_v43 = vmul.f32 0.2, %v125_v40  ;;  %v136_v44 = vpop.f32.mrf.mxu2  ;;  %v148_v45 = vpop.f32.mrf.mxu3 }
  0x97   :  { %v190_v46 = vsel %vm158_vm7, %v113_v39, %v174_v42  ;;  %v137_v47 = vadd.f32 %v361_v21, %v136_v44  ;;  %v149_v48 = vadd.f32 %v361_v21, %v148_v45 }
  0x98   :  { %207 = vst.msk [vmem:[%s446_s3 + $0x8] sm:$0xff] %vm205_vm2, %v190_v46  ;;  %v194_v49 = vsel %vm162_vm8, %v125_v40, %v178_v43 }
  0x99   :  { %211 = vst.msk [vmem:[%s446_s3 + $0x28] sm:$0xff] %vm205_vm2, %v194_v49  ;;  %vm166_vm9 = vcmp.gt.f32.partialorder %v137_v47, 0.0  ;;  %v182_v50 = vmul.f32 0.2, %v137_v47  ;;  %vm170_vm10 = vcmp.gt.f32.partialorder %v149_v48, 0.0 }
  0x9a   :  { %v186_v51 = vmul.f32 0.2, %v149_v48  ;;  %v115_v52 = vpop.f32.mrf.mxu0  ;;  %v127_v53 = vpop.f32.mrf.mxu1 }
  0x9b   :  { %v198_v54 = vsel %vm166_vm9, %v137_v47, %v182_v50  ;;  %v116_v55 = vadd.f32 %v361_v21, %v115_v52  ;;  %v128_v56 = vadd.f32 %v361_v21, %v127_v53 }
  0x9c   :  { %215 = vst.msk [vmem:[%s446_s3 + $0x48] sm:$0xff] %vm205_vm2, %v198_v54  ;;  %v202_v57 = vsel %vm170_vm10, %v149_v48, %v186_v51 }
  0x9d   :  { %219 = vst.msk [vmem:[%s446_s3 + $0x68] sm:$0xff] %vm205_vm2, %v202_v57  ;;  %vm159_vm11 = vcmp.gt.f32.partialorder %v116_v55, 0.0  ;;  %v175_v58 = vmul.f32 0.2, %v116_v55  ;;  %vm163_vm12 = vcmp.gt.f32.partialorder %v128_v56, 0.0 }
  0x9e   :  { %v179_v59 = vmul.f32 0.2, %v128_v56  ;;  %v139_v60 = vpop.f32.mrf.mxu2  ;;  %v151_v61 = vpop.f32.mrf.mxu3 }
  0x9f   :  { %v191_v62 = vsel %vm159_vm11, %v116_v55, %v175_v58  ;;  %v140_v63 = vadd.f32 %v361_v21, %v139_v60  ;;  %v152_v0 = vadd.f32 %v361_v21, %v151_v61 }
  0xa0   :  { %208 = vst.msk [vmem:[%s446_s3 + $0x10] sm:$0xff] %vm205_vm2, %v191_v62  ;;  %v195_v1 = vsel %vm163_vm12, %v128_v56, %v179_v59 }
  0xa1   :  { %212 = vst.msk [vmem:[%s446_s3 + $0x30] sm:$0xff] %vm205_vm2, %v195_v1  ;;  %vm167_vm13 = vcmp.gt.f32.partialorder %v140_v63, 0.0  ;;  %v183_v2 = vmul.f32 0.2, %v140_v63  ;;  %vm171_vm14 = vcmp.gt.f32.partialorder %v152_v0, 0.0 }
  0xa2   :  { %v187_v3 = vmul.f32 0.2, %v152_v0  ;;  %v118_v4 = vpop.f32.mrf.mxu0  ;;  %v130_v5 = vpop.f32.mrf.mxu1 }
  0xa3   :  { %v199_v6 = vsel %vm167_vm13, %v140_v63, %v183_v2  ;;  %v119_v7 = vadd.f32 %v361_v21, %v118_v4  ;;  %v131_v8 = vadd.f32 %v361_v21, %v130_v5 }
  0xa4   :  { %216 = vst.msk [vmem:[%s446_s3 + $0x50] sm:$0xff] %vm205_vm2, %v199_v6  ;;  %v203_v9 = vsel %vm171_vm14, %v152_v0, %v187_v3 }
  0xa5   :  { %220 = vst.msk [vmem:[%s446_s3 + $0x70] sm:$0xff] %vm205_vm2, %v203_v9  ;;  %vm160_vm15 = vcmp.gt.f32.partialorder %v119_v7, 0.0  ;;  %v176_v10 = vmul.f32 0.2, %v119_v7  ;;  %vm164_vm0 = vcmp.gt.f32.partialorder %v131_v8, 0.0 }
  0xa6   :  { %v180_v11 = vmul.f32 0.2, %v131_v8  ;;  %v142_v12 = vpop.f32.mrf.mxu2  ;;  %v154_v13 = vpop.f32.mrf.mxu3 }
  0xa7   :  { %v192_v14 = vsel %vm160_vm15, %v119_v7, %v176_v10  ;;  %v143_v15 = vadd.f32 %v361_v21, %v142_v12  ;;  %v155_v16 = vadd.f32 %v361_v21, %v154_v13 }
  0xa8   :  { %209 = vst.msk [vmem:[%s446_s3 + $0x18] sm:$0xff] %vm205_vm2, %v192_v14  ;;  %v196_v17 = vsel %vm164_vm0, %v131_v8, %v180_v11 }
  0xa9   :  { %213 = vst.msk [vmem:[%s446_s3 + $0x38] sm:$0xff] %vm205_vm2, %v196_v17  ;;  %vm168_vm1 = vcmp.gt.f32.partialorder %v143_v15, 0.0  ;;  %v184_v18 = vmul.f32 0.2, %v143_v15  ;;  %vm172_vm3 = vcmp.gt.f32.partialorder %v155_v16, 0.0 }
  0xaa   :  { %v188_v19 = vmul.f32 0.2, %v155_v16 }
  0xab   :  { %v200_v20 = vsel %vm168_vm1, %v143_v15, %v184_v18 }
  0xac   :  { %217 = vst.msk [vmem:[%s446_s3 + $0x58] sm:$0xff] %vm205_vm2, %v200_v20  ;;  %v204_v21 = vsel %vm172_vm3, %v155_v16, %v188_v19 }
  0xad   :  { %221 = vst.msk [vmem:[%s446_s3 + $0x78] sm:$0xff] %vm205_vm2, %v204_v21 }

// kernel: behavior_vae_forward.4
= control target key start
LH: loop header
LB: loop body
LE: loop exit
PB: predicated region body
PF: predicated region fallthrough
CT: control target
= control target key end

     0   :  { %vm66_vm0 = vcmask 261120   ;;  %vm178_vm2 = vcmask 523264   ;;  %s395_s1 = inlined_call_operand.vmem [shape: f32[288,64], index: 1, kind: input, shape index: {}]   ;;  %s396_s0 = inlined_call_operand.vmem [shape: f32[32,288], index: 0, kind: input, shape index: {}]   ;;  %s397_s2 = inlined_call_operand.vmem [shape: f32[1,64], index: 2, kind: input, shape index: {}]   ;;  %s398_s3 = inlined_call_operand.vmem [shape: f32[32,64], index: 3, kind: output, shape index: {}]  }
   0x1   :  { %v41_v0 = vld [vmem:[%s395_s1 + $0x78] sm:$0xff]  ;;  %v40_v2 = vld [vmem:[%s395_s1 + $0x70] sm:$0xff]  ;;  %v39_v4 = vld [vmem:[%s395_s1 + $0x68] sm:$0xff] }
   0x2   :  { %v57_v1 = vld [vmem:[%s395_s1 + $0xf8] sm:$0xff]  ;;  %79 = vmatpush.msra.mxu0 %v41_v0  ;;  %191 = vmatpush.msra.mxu3 %v41_v0  ;;  %v56_v3 = vld [vmem:[%s395_s1 + $0xf0] sm:$0xff]  ;;  %v55_v5 = vld [vmem:[%s395_s1 + $0xe8] sm:$0xff] }
   0x3   :  { %108 = vmatpush.msra.mxu1 %v57_v1  ;;  %v38_v6 = vld [vmem:[%s395_s1 + $0x60] sm:$0xff]  ;;  %v37_v8 = vld [vmem:[%s395_s1 + $0x58] sm:$0xff]  ;;  %v36_v11 = vld [vmem:[%s395_s1 + $0x50] sm:$0xff] }
   0x4   :  { %80 = vmatpush.msra.mxu0 %v40_v2  ;;  %192 = vmatpush.msra.mxu3 %v40_v2  ;;  %v54_v7 = vld [vmem:[%s395_s1 + $0xe0] sm:$0xff]  ;;  %v53_v9 = vld [vmem:[%s395_s1 + $0xd8] sm:$0xff]  ;;  %v60_v12 = vld [vmem:[%s395_s1 + $0x110] sm:$0xff] }
   0x5   :  { %109 = vmatpush.msra.mxu1 %v56_v3  ;;  %v61_v10 = vld [vmem:[%s395_s1 + $0x118] sm:$0xff]  ;;  %v52_v13 = vld [vmem:[%s395_s1 + $0xd0] sm:$0xff]  ;;  %v59_v14 = vld [vmem:[%s395_s1 + $0x108] sm:$0xff] }
   0x6   :  { %81 = vmatpush.msra.mxu0 %v39_v4  ;;  %193 = vmatpush.msra.mxu3 %v39_v4  ;;  %v35_v15 = vld [vmem:[%s395_s1 + $0x48] sm:$0xff]  ;;  %v58_v17 = vld [vmem:[%s395_s1 + $0x100] sm:$0xff]  ;;  %v16_v20 = vld [vmem:[%s396_s0 + $0x10] sm:$0xff] }
   0x7   :  { %110 = vmatpush.msra.mxu1 %v55_v5  ;;  %149 = vmatpush.msra.mxu2 %v61_v10  ;;  %v51_v16 = vld [vmem:[%s395_s1 + $0xc8] sm:$0xff]  ;;  %v34_v18 = vld [vmem:[%s395_s1 + $0x40] sm:$0xff]  ;;  %v33_v21 = vld [vmem:[%s395_s1 + $0x38] sm:$0xff] }
   0x8   :  { %82 = vmatpush.msra.mxu0 %v38_v6  ;;  %194 = vmatpush.msra.mxu3 %v38_v6  ;;  %v50_v19 = vld [vmem:[%s395_s1 + $0xc0] sm:$0xff]  ;;  %v49_v22 = vld [vmem:[%s395_s1 + $0xb8] sm:$0xff]  ;;  %v32_v23 = vld [vmem:[%s395_s1 + $0x30] sm:$0xff] }
   0x9   :  { %111 = vmatpush.msra.mxu1 %v54_v7  ;;  %150 = vmatpush.msra.mxu2 %v60_v12  ;;  %v48_v24 = vld [vmem:[%s395_s1 + $0xb0] sm:$0xff]  ;;  %v31_v25 = vld [vmem:[%s395_s1 + $0x28] sm:$0xff]  ;;  %v30_v27 = vld [vmem:[%s395_s1 + $0x20] sm:$0xff] }
   0xa   :  { %83 = vmatpush.msra.mxu0 %v37_v8  ;;  %195 = vmatpush.msra.mxu3 %v37_v8  ;;  %v47_v26 = vld [vmem:[%s395_s1 + $0xa8] sm:$0xff]  ;;  %v46_v28 = vld [vmem:[%s395_s1 + $0xa0] sm:$0xff]  ;;  %v29_v30 = vld [vmem:[%s395_s1 + $0x18] sm:$0xff] }
   0xb   :  { %112 = vmatpush.msra.mxu1 %v53_v9  ;;  %151 = vmatpush.msra.mxu2 %v59_v14  ;;  %v19_v29 = vld [vmem:[%s396_s0 + $0x28] sm:$0xff]  ;;  %v45_v31 = vld [vmem:[%s395_s1 + $0x98] sm:$0xff]  ;;  %v28_v32 = vld [vmem:[%s395_s1 + $0x10] sm:$0xff] }
   0xc   :  { %84 = vmatpush.msra.mxu0 %v36_v11  ;;  %196 = vmatpush.msra.mxu3 %v36_v11  ;;  %v44_v33 = vld [vmem:[%s395_s1 + $0x90] sm:$0xff]  ;;  %v27_v34 = vld [vmem:[%s395_s1 + $0x8] sm:$0xff]  ;;  %v26_v36 = vld [vmem:[%s395_s1] sm:$0xff] }
   0xd   :  { %113 = vmatpush.msra.mxu1 %v52_v13  ;;  %152 = vmatpush.msra.mxu2 %v58_v17  ;;  %v43_v35 = vld [vmem:[%s395_s1 + $0x88] sm:$0xff]  ;;  %v42_v37 = vld [vmem:[%s395_s1 + $0x80] sm:$0xff]  ;;  %v17_v39 = vld [vmem:[%s396_s0 + $0x18] sm:$0xff] }
   0xe   :  { %85 = vmatpush.msra.mxu0 %v35_v15  ;;  %197 = vmatpush.msra.mxu3 %v35_v15  ;;  %v14_v38 = vld [vmem:[%s396_s0] sm:$0xff]  ;;  %v15_v40 = vld [vmem:[%s396_s0 + $0x8] sm:$0xff]  ;;  %v20_v42 = vld [vmem:[%s396_s0 + $0x30] sm:$0xff] }
   0xf   :  { %114 = vmatpush.msra.mxu1 %v51_v16  ;;  %187 = vmatmul.msk.f32.vlgmr.msra.gmra.mxu2 %vm66_vm0, %v16_v20  ;;  %v22_v41 = vld [vmem:[%s396_s0 + $0x40] sm:$0xff]  ;;  %v25_v44 = vld [vmem:[%s396_s0 + $0x58] sm:$0xff]  ;;  %v23_v45 = vld [vmem:[%s396_s0 + $0x48] sm:$0xff] }
  0x10   :  { %86 = vmatpush.msra.mxu0 %v34_v18  ;;  %198 = vmatpush.msra.mxu3 %v34_v18  ;;  %v18_v43 = vld [vmem:[%s396_s0 + $0x20] sm:$0xff]  ;;  %v21_v46 = vld [vmem:[%s396_s0 + $0x38] sm:$0xff]  ;;  %v24_v47 = vld [vmem:[%s396_s0 + $0x50] sm:$0xff] }
  0x11   :  { %115 = vmatpush.msra.mxu1 %v50_v19  ;;  %v207_v49 = vld [vmem:[%s397_s2] ss:$0 sm:$0xff] }
  0x12   :  { %87 = vmatpush.msra.mxu0 %v33_v21  ;;  %199 = vmatpush.msra.mxu3 %v33_v21 }
  0x13   :  { %116 = vmatpush.msra.mxu1 %v49_v22 }
  0x14   :  { %88 = vmatpush.msra.mxu0 %v32_v23  ;;  %200 = vmatpush.msra.mxu3 %v32_v23 }
  0x15   :  { %117 = vmatpush.msra.mxu1 %v48_v24 }
  0x16   :  { %89 = vmatpush.msra.mxu0 %v31_v25  ;;  %201 = vmatpush.msra.mxu3 %v31_v25 }
  0x17   :  { %118 = vmatpush.msra.mxu1 %v47_v26  ;;  %188 = vmatmul.msk.f32.gmra.mxu2 %vm66_vm0, %v19_v29 }
  0x18   :  { %90 = vmatpush.msra.mxu0 %v30_v27  ;;  %202 = vmatpush.msra.mxu3 %v30_v27 }
  0x19   :  { %119 = vmatpush.msra.mxu1 %v46_v28 }
  0x1a   :  { %91 = vmatpush.msra.mxu0 %v29_v30  ;;  %203 = vmatpush.msra.mxu3 %v29_v30 }
  0x1b   :  { %120 = vmatpush.msra.mxu1 %v45_v31 }
  0x1c   :  { %92 = vmatpush.msra.mxu0 %v28_v32  ;;  %204 = vmatpush.msra.mxu3 %v28_v32 }
  0x1d   :  { %121 = vmatpush.msra.mxu1 %v44_v33 }
  0x1e   :  { %93 = vmatpush.msra.mxu0 %v27_v34  ;;  %205 = vmatpush.msra.mxu3 %v27_v34 }
  0x1f   :  { %122 = vmatpush.msra.mxu1 %v43_v35  ;;  %189 = vmatmul.msk.f32.gmra.mxu2 %vm66_vm0, %v22_v41 }
  0x20   :  { %94 = vmatpush.msra.mxu0 %v26_v36  ;;  %206 = vmatpush.msra.mxu3 %v26_v36 }
  0x21   :  { %123 = vmatpush.msra.mxu1 %v42_v37  ;;  %95 = vmatmul.f32.vlgmr.msra.gmra.mxu0 %v14_v38 }
  0x22   :  { %98 = vmatmul.f32.vlgmr.msra.gmra.mxu3 %v17_v39  ;;  %124 = vmatmul.f32.vlgmr.msra.gmra.mxu1 %v15_v40 }
  0x27   :  { %190 = vmatmul.msk.f32.gmra.mxu2 %vm66_vm0, %v25_v44 }
  0x2a   :  { %101 = vmatmul.f32.gmra.mxu3 %v20_v42  ;;  %127 = vmatmul.f32.gmra.mxu1 %v18_v43 }
  0x32   :  { %104 = vmatmul.f32.gmra.mxu3 %v23_v45  ;;  %130 = vmatmul.f32.gmra.mxu1 %v21_v46 }
  0x3a   :  { %133 = vmatmul.f32.gmra.mxu1 %v24_v47 }
  0x92   :  { %v154_v48 = vpop.f32.mrf.mxu2 }
  0x9a   :  { %v157_v55 = vpop.f32.mrf.mxu2 }
  0x9e   :  { %v96_v50 = vpop.f32.mrf.mxu0 }
  0x9f   :  { %v97_v51 = vadd.f32 %v207_v49, %v96_v50  ;;  %v125_v52 = vpop.f32.mrf.mxu1 }
  0xa1   :  { %v126_v53 = vadd.f32 %v125_v52, %v97_v51 }
  0xa2   :  { %v160_v1 = vpop.f32.mrf.mxu2 }
  0xa3   :  { %v155_v54 = vadd.f32 %v154_v48, %v126_v53 }
  0xa5   :  { %vm166_vm1 = vcmp.gt.f32.partialorder %v155_v54, 0.0  ;;  %v170_v56 = vmul.f32 0.2, %v155_v54  ;;  %v99_v57 = vpop.f32.mrf.mxu3 }
  0xa6   :  { %v100_v58 = vadd.f32 %v207_v49, %v99_v57 }
  0xa7   :  { %v174_v59 = vsel %vm166_vm1, %v155_v54, %v170_v56  ;;  %v128_v60 = vpop.f32.mrf.mxu1 }
  0xa8   :  { %179 = vst.msk [vmem:[%s398_s3] sm:$0xff] %vm178_vm2, %v174_v59  ;;  %v129_v61 = vadd.f32 %v128_v60, %v100_v58 }
  0xaa   :  { %v158_v62 = vadd.f32 %v157_v55, %v129_v61  ;;  %v163_v12 = vpop.f32.mrf.mxu2 }
  0xac   :  { %vm167_vm3 = vcmp.gt.f32.partialorder %v158_v62, 0.0  ;;  %v171_v63 = vmul.f32 0.2, %v158_v62 }
  0xad   :  { %v102_v0 = vpop.f32.mrf.mxu3 }
  0xae   :  { %v175_v2 = vsel %vm167_vm3, %v158_v62, %v171_v63  ;;  %v103_v3 = vadd.f32 %v207_v49, %v102_v0 }
  0xaf   :  { %180 = vst.msk [vmem:[%s398_s3 + $0x8] sm:$0xff] %vm178_vm2, %v175_v2  ;;  %v131_v4 = vpop.f32.mrf.mxu1 }
  0xb0   :  { %v132_v5 = vadd.f32 %v131_v4, %v103_v3 }
  0xb2   :  { %v161_v6 = vadd.f32 %v160_v1, %v132_v5 }
  0xb4   :  { %vm168_vm4 = vcmp.gt.f32.partialorder %v161_v6, 0.0  ;;  %v172_v7 = vmul.f32 0.2, %v161_v6 }
  0xb5   :  { %v105_v8 = vpop.f32.mrf.mxu3 }
  0xb6   :  { %v176_v9 = vsel %vm168_vm4, %v161_v6, %v172_v7  ;;  %v106_v10 = vadd.f32 %v207_v49, %v105_v8 }
  0xb7   :  { %181 = vst.msk [vmem:[%s398_s3 + $0x10] sm:$0xff] %vm178_vm2, %v176_v9  ;;  %v134_v11 = vpop.f32.mrf.mxu1 }
  0xb8   :  { %v135_v13 = vadd.f32 %v134_v11, %v106_v10 }
  0xba   :  { %v164_v14 = vadd.f32 %v163_v12, %v135_v13 }
  0xbc   :  { %vm169_vm5 = vcmp.gt.f32.partialorder %v164_v14, 0.0  ;;  %v173_v15 = vmul.f32 0.2, %v164_v14 }
  0xbe   :  { %v177_v16 = vsel %vm169_vm5, %v164_v14, %v173_v15 }
  0xbf   :  { %182 = vst.msk [vmem:[%s398_s3 + $0x18] sm:$0xff] %vm178_vm2, %v177_v16 }

// kernel: behavior_vae_forward.5
= control target key start
LH: loop header
LB: loop body
LE: loop exit
PB: predicated region body
PF: predicated region fallthrough
CT: control target
= control target key end

     0   :  { %s2259_s0 = inlined_call_operand.vmem [shape: f32[2,1024], index: 0, kind: input, shape index: {}]   ;;  %s2260_s1 = inlined_call_operand.vmem [shape: bf16[1024,64], index: 1, kind: input, shape index: {}]   ;;  %s2261_s2 = inlined_call_operand.vmem [shape: f32[64,32], index: 2, kind: input, shape index: {}]   ;;  %s2262_s3 = inlined_call_operand.vmem [shape: f32[32,32], index: 3, kind: input, shape index: {}]   ;;  %s2263_s4 = inlined_call_operand.vmem [shape: f32[2,16], index: 4, kind: input, shape index: {}]   ;;  %s2264_s5 = inlined_call_operand.vmem [shape: f32[16,32], index: 5, kind: input, shape index: {}]   ;;  %s2265_s6 = inlined_call_operand.vmem [shape: bf16[32,1024], index: 6, kind: input, shape index: {}]   ;;  %s2266_s7 = inlined_call_operand.vmem [shape: f32[5,1024], index: 7, kind: input, shape index: {}]   ;;  %s2267_s8 = inlined_call_operand.vmem [shape: f32[2,32], index: 8, kind: output, shape index: {0}]   ;;  %s2268_s9 = inlined_call_operand.hbm [shape: f32[2,16], index: 9, kind: output, shape index: {1}]   ;;  %s2269_s10 = inlined_call_operand.vmem [shape: f32[2,1024], index: 10, kind: output, shape index: {2}]  }
   0x1   :  { %v1565_v0 = vld [vmem:[%s2260_s1 + $0x38] sm:$0xff]  ;;  %v1564_v4 = vld [vmem:[%s2260_s1 + $0x30] sm:$0xff]  ;;  %v1563_v8 = vld [vmem:[%s2260_s1 + $0x28] sm:$0xff] }
   0x2   :  { %v1573_v1 = vld [vmem:[%s2260_s1 + $0x78] sm:$0xff]  ;;  %578 = vmatpush.bf16.msra.mxu0 %v1565_v0  ;;  %v1572_v5 = vld [vmem:[%s2260_s1 + $0x70] sm:$0xff]  ;;  %v1571_v9 = vld [vmem:[%s2260_s1 + $0x68] sm:$0xff] }
   0x3   :  { %v1581_v2 = vld [vmem:[%s2260_s1 + $0xb8] sm:$0xff]  ;;  %591 = vmatpush.bf16.msra.mxu1 %v1573_v1  ;;  %v1580_v6 = vld [vmem:[%s2260_s1 + $0xb0] sm:$0xff]  ;;  %v1579_v10 = vld [vmem:[%s2260_s1 + $0xa8] sm:$0xff] }
   0x4   :  { %v1589_v3 = vld [vmem:[%s2260_s1 + $0xf8] sm:$0xff]  ;;  %604 = vmatpush.bf16.msra.mxu2 %v1581_v2  ;;  %v1588_v7 = vld [vmem:[%s2260_s1 + $0xf0] sm:$0xff]  ;;  %v1587_v11 = vld [vmem:[%s2260_s1 + $0xe8] sm:$0xff] }
   0x5   :  { %617 = vmatpush.bf16.msra.mxu3 %v1589_v3  ;;  %v1562_v12 = vld [vmem:[%s2260_s1 + $0x20] sm:$0xff]  ;;  %v1561_v17 = vld [vmem:[%s2260_s1 + $0x18] sm:$0xff]  ;;  %v1560_v21 = vld [vmem:[%s2260_s1 + $0x10] sm:$0xff] }
   0x6   :  { %579 = vmatpush.bf16.msra.mxu0 %v1564_v4  ;;  %v1570_v13 = vld [vmem:[%s2260_s1 + $0x60] sm:$0xff]  ;;  %v1569_v18 = vld [vmem:[%s2260_s1 + $0x58] sm:$0xff]  ;;  %v1568_v22 = vld [vmem:[%s2260_s1 + $0x50] sm:$0xff] }
   0x7   :  { %592 = vmatpush.bf16.msra.mxu1 %v1572_v5  ;;  %v1578_v14 = vld [vmem:[%s2260_s1 + $0xa0] sm:$0xff]  ;;  %v1577_v19 = vld [vmem:[%s2260_s1 + $0x98] sm:$0xff] }
   0x8   :  { %605 = vmatpush.bf16.msra.mxu2 %v1580_v6  ;;  %v1586_v15 = vld [vmem:[%s2260_s1 + $0xe0] sm:$0xff]  ;;  %v1585_v20 = vld [vmem:[%s2260_s1 + $0xd8] sm:$0xff] }
   0x9   :  { %618 = vmatpush.bf16.msra.mxu3 %v1588_v7  ;;  %v34_v16 = vld [vmem:[%s2259_s0] sm:$0xff] }
   0xa   :  { %580 = vmatpush.bf16.msra.mxu0 %v1563_v8  ;;  %38 = vst [vmem:[#allocation1] ss:$4 sm:$0xff] %v34_v16 }
   0xb   :  { %593 = vmatpush.bf16.msra.mxu1 %v1571_v9 }
   0xc   :  { %606 = vmatpush.bf16.msra.mxu2 %v1579_v10 }
   0xd   :  { %619 = vmatpush.bf16.msra.mxu3 %v1587_v11 }
   0xe   :  { %581 = vmatpush.bf16.msra.mxu0 %v1562_v12 }
   0xf   :  { %594 = vmatpush.bf16.msra.mxu1 %v1570_v13 }
  0x10   :  { %607 = vmatpush.bf16.msra.mxu2 %v1578_v14 }
  0x11   :  { %620 = vmatpush.bf16.msra.mxu3 %v1586_v15 }
  0x12   :  { %582 = vmatpush.bf16.msra.mxu0 %v1561_v17 }
  0x13   :  { %595 = vmatpush.bf16.msra.mxu1 %v1569_v18 }
  0x14   :  { %16 = vsyncpa [#allocation3], 0  ;;  %608 = vmatpush.bf16.msra.mxu2 %v1577_v19  ;;  %v1576_v23 = vld [vmem:[%s2260_s1 + $0x90] sm:$0xff]  ;;  %v1559_v25 = vld [vmem:[%s2260_s1 + $0x8] sm:$0xff]  ;;  %vm694_vm1 = vcmask 523264   ;;  %vm726_vm3 = vcmask 261120  }
  0x15   :  { %621 = vmatpush.bf16.msra.mxu3 %v1585_v20  ;;  %v1584_v24 = vld [vmem:[%s2260_s1 + $0xd0] sm:$0xff]  ;;  %v1567_v26 = vld [vmem:[%s2260_s1 + $0x48] sm:$0xff]  ;;  %v1558_v30 = vld [vmem:[%s2260_s1] sm:$0xff]  ;;  %vm753_vm5 = vcmask 254976   ;;  %vm770_vm6 = vcmask 130048   ;;  %vm765_vm7 = vcmask 123904  }
  0x16   :  { %583 = vmatpush.bf16.msra.mxu0 %v1560_v21  ;;  %v1575_v27 = vld [vmem:[%s2260_s1 + $0x88] sm:$0xff]  ;;  %v1566_v31 = vld [vmem:[%s2260_s1 + $0x40] sm:$0xff]  ;;  %v1597_v34 = vld [vmem:[%s2260_s1 + $0x138] sm:$0xff]  ;;  %s1210_s24 = sshll.u32 %s2268_s9, 4  ;;  %vm1188_vm15 = vcmask 1041408   ;;  %s1211_s24 = int_to_ptr.hbm [resolvable:$true] %s1210_s24 }
  0x17   :  { %596 = vmatpush.bf16.msra.mxu1 %v1568_v22  ;;  %v1583_v28 = vld [vmem:[%s2260_s1 + $0xc8] sm:$0xff]  ;;  %v1574_v32 = vld [vmem:[%s2260_s1 + $0x80] sm:$0xff]  ;;  %v1605_v35 = vld [vmem:[%s2260_s1 + $0x178] sm:$0xff] }
  0x18   :  { %609 = vmatpush.bf16.msra.mxu2 %v1576_v23  ;;  %v35_v29 = vld [vmem:[%s2259_s0 + $0x8] sm:$0xff]  ;;  %v1582_v33 = vld [vmem:[%s2260_s1 + $0xc0] sm:$0xff]  ;;  %v43_v36 = vld.sshfl [vmem:[#allocation1 + $0x10] sm:$0xff pattern:$0x73625140] }
  0x19   :  { %622 = vmatpush.bf16.msra.mxu3 %v1584_v24  ;;  %40 = vst [vmem:[#allocation1 + $0x20] ss:$4 sm:$0xff] %v35_v29  ;;  %v41_v37 = vld.sshfl [vmem:[#allocation1] sm:$0xff pattern:$0x73625140]  ;;  %v1613_v40 = vld [vmem:[%s2260_s1 + $0x1b8] sm:$0xff]  ;;  %v59_v42 = vpack.c.bf16 %v43_v36, %v43_v36 }
  0x1a   :  { %584 = vmatpush.bf16.msra.mxu0 %v1559_v25  ;;  %v44_v38 = vld.sshfl [vmem:[#allocation1 + $0x18] sm:$0xff pattern:$0x73625140]  ;;  %v42_v39 = vld.sshfl [vmem:[#allocation1 + $0x8] sm:$0xff pattern:$0x73625140]  ;;  %v57_v43 = vpack.c.bf16 %v41_v37, %v41_v37 }
  0x1b   :  { %597 = vmatpush.bf16.msra.mxu1 %v1567_v26  ;;  %v1621_v41 = vld [vmem:[%s2260_s1 + $0x1f8] sm:$0xff]  ;;  %v60_v44 = vpack.c.bf16 %v44_v38, %v44_v38  ;;  %v58_v45 = vpack.c.bf16 %v42_v39, %v42_v39  ;;  %v1596_v46 = vld [vmem:[%s2260_s1 + $0x130] sm:$0xff]  ;;  %v1595_v50 = vld [vmem:[%s2260_s1 + $0x128] sm:$0xff] }
  0x1c   :  { %610 = vmatpush.bf16.msra.mxu2 %v1575_v27  ;;  %v1604_v47 = vld [vmem:[%s2260_s1 + $0x170] sm:$0xff]  ;;  %v1603_v51 = vld [vmem:[%s2260_s1 + $0x168] sm:$0xff]  ;;  %v1594_v54 = vld [vmem:[%s2260_s1 + $0x120] sm:$0xff] }
  0x1d   :  { %623 = vmatpush.bf16.msra.mxu3 %v1583_v28  ;;  %v1612_v48 = vld [vmem:[%s2260_s1 + $0x1b0] sm:$0xff]  ;;  %v1611_v52 = vld [vmem:[%s2260_s1 + $0x1a8] sm:$0xff]  ;;  %v1602_v55 = vld [vmem:[%s2260_s1 + $0x160] sm:$0xff] }
  0x1e   :  { %585 = vmatpush.bf16.msra.mxu0 %v1558_v30  ;;  %v1620_v49 = vld [vmem:[%s2260_s1 + $0x1f0] sm:$0xff]  ;;  %v1619_v53 = vld [vmem:[%s2260_s1 + $0x1e8] sm:$0xff]  ;;  %v1610_v56 = vld [vmem:[%s2260_s1 + $0x1a0] sm:$0xff] }
  0x1f   :  { %598 = vmatpush.bf16.msra.mxu1 %v1566_v31  ;;  %v1618_v57 = vld [vmem:[%s2260_s1 + $0x1e0] sm:$0xff]  ;;  %v1593_v58 = vld [vmem:[%s2260_s1 + $0x118] sm:$0xff]  ;;  %v1592_v62 = vld [vmem:[%s2260_s1 + $0x110] sm:$0xff] }
  0x20   :  { %611 = vmatpush.bf16.msra.mxu2 %v1574_v32  ;;  %v1601_v59 = vld [vmem:[%s2260_s1 + $0x158] sm:$0xff]  ;;  %v1600_v63 = vld [vmem:[%s2260_s1 + $0x150] sm:$0xff]  ;;  %v1591_v2 = vld [vmem:[%s2260_s1 + $0x108] sm:$0xff] }
  0x21   :  { %624 = vmatpush.bf16.msra.mxu3 %v1582_v33  ;;  %586 = vmatmul.bf16.vlgmr.msra.gmra.mxu0 %v57_v43  ;;  %v1609_v60 = vld [vmem:[%s2260_s1 + $0x198] sm:$0xff]  ;;  %v1608_v0 = vld [vmem:[%s2260_s1 + $0x190] sm:$0xff]  ;;  %v1599_v3 = vld [vmem:[%s2260_s1 + $0x148] sm:$0xff] }
  0x22   :  { %630 = vmatpush.bf16.msrb.mxu0 %v1597_v34  ;;  %599 = vmatmul.bf16.vlgmr.msra.gmra.mxu1 %v58_v45  ;;  %v1617_v61 = vld [vmem:[%s2260_s1 + $0x1d8] sm:$0xff]  ;;  %v1616_v1 = vld [vmem:[%s2260_s1 + $0x1d0] sm:$0xff]  ;;  %v1607_v4 = vld [vmem:[%s2260_s1 + $0x188] sm:$0xff] }
  0x23   :  { %643 = vmatpush.bf16.msrb.mxu1 %v1605_v35  ;;  %612 = vmatmul.bf16.vlgmr.msra.gmra.mxu2 %v59_v42  ;;  %v1615_v5 = vld [vmem:[%s2260_s1 + $0x1c8] sm:$0xff]  ;;  %v1590_v6 = vld [vmem:[%s2260_s1 + $0x100] sm:$0xff]  ;;  %v47_v12 = vld.sshfl [vmem:[#allocation1 + $0x30] sm:$0xff pattern:$0x73625140] }
  0x24   :  { %656 = vmatpush.bf16.msrb.mxu2 %v1613_v40  ;;  %625 = vmatmul.bf16.vlgmr.msra.gmra.mxu3 %v60_v44  ;;  %v1598_v7 = vld [vmem:[%s2260_s1 + $0x140] sm:$0xff]  ;;  %v46_v11 = vld.sshfl [vmem:[#allocation1 + $0x28] sm:$0xff pattern:$0x73625140]  ;;  %v63_v16 = vpack.c.bf16 %v47_v12, %v47_v12  ;;  %v692_v18 = vld [vmem:[%s2261_s2 + $0x38] sm:$0xff] }
  0x25   :  { %669 = vmatpush.bf16.msrb.mxu3 %v1621_v41  ;;  %v1606_v8 = vld [vmem:[%s2260_s1 + $0x180] sm:$0xff]  ;;  %v48_v13 = vld.sshfl [vmem:[#allocation1 + $0x38] sm:$0xff pattern:$0x73625140]  ;;  %v62_v15 = vpack.c.bf16 %v46_v11, %v46_v11  ;;  %v691_v19 = vld [vmem:[%s2261_s2 + $0x30] sm:$0xff] }
  0x26   :  { %631 = vmatpush.bf16.msrb.mxu0 %v1596_v46  ;;  %v1614_v9 = vld [vmem:[%s2260_s1 + $0x1c0] sm:$0xff]  ;;  %v64_v17 = vpack.c.bf16 %v48_v13, %v48_v13  ;;  %v690_v21 = vld [vmem:[%s2261_s2 + $0x28] sm:$0xff]  ;;  %v688_v24 = vld [vmem:[%s2261_s2 + $0x18] sm:$0xff] }
  0x27   :  { %644 = vmatpush.bf16.msrb.mxu1 %v1604_v47  ;;  %v45_v10 = vld.sshfl [vmem:[#allocation1 + $0x20] sm:$0xff pattern:$0x73625140]  ;;  %v687_v26 = vld [vmem:[%s2261_s2 + $0x10] sm:$0xff]  ;;  %v686_v29 = vld [vmem:[%s2261_s2 + $0x8] sm:$0xff] }
  0x28   :  { %657 = vmatpush.bf16.msrb.mxu2 %v1612_v48  ;;  %v61_v14 = vpack.c.bf16 %v45_v10, %v45_v10  ;;  %v689_v22 = vld [vmem:[%s2261_s2 + $0x20] sm:$0xff]  ;;  %v724_v32 = vld [vmem:[%s2262_s3 + $0x18] sm:$0xff]  ;;  %v723_v33 = vld [vmem:[%s2262_s3 + $0x10] sm:$0xff] }
  0x29   :  { %670 = vmatpush.bf16.msrb.mxu3 %v1620_v49  ;;  %v685_v31 = vld [vmem:[%s2261_s2] sm:$0xff]  ;;  %v722_v36 = vld [vmem:[%s2262_s3 + $0x8] sm:$0xff] }
  0x2a   :  { %632 = vmatpush.bf16.msrb.mxu0 %v1595_v50  ;;  %v193_v34 = vld [vmem:[%s2266_s7] ss:$0 sm:$0xff] }
  0x2b   :  { %645 = vmatpush.bf16.msrb.mxu1 %v1603_v51  ;;  %v755_v11 = vld [vmem:[%s2263_s4] sm:$0x3] }
  0x2c   :  { %658 = vmatpush.bf16.msrb.mxu2 %v1611_v52 }
  0x2d   :  { %671 = vmatpush.bf16.msrb.mxu3 %v1619_v53 }
  0x2e   :  { %633 = vmatpush.bf16.msrb.mxu0 %v1594_v54 }
  0x2f   :  { %646 = vmatpush.bf16.msrb.mxu1 %v1602_v55 }
  0x30   :  { %659 = vmatpush.bf16.msrb.mxu2 %v1610_v56  ;;  %v721_v56 = vld [vmem:[%s2262_s3] sm:$0xff] }
  0x31   :  { %672 = vmatpush.bf16.msrb.mxu3 %v1618_v57  ;;  %v693_v57 = vld [vmem:[%s2266_s7 + $0x1] ss:$0 sm:$0xff] }
  0x32   :  { %634 = vmatpush.bf16.msrb.mxu0 %v1593_v58 }
  0x33   :  { %647 = vmatpush.bf16.msrb.mxu1 %v1601_v59 }
  0x34   :  { %660 = vmatpush.bf16.msrb.mxu2 %v1609_v60 }
  0x35   :  { %673 = vmatpush.bf16.msrb.mxu3 %v1617_v61 }
  0x36   :  { %635 = vmatpush.bf16.msrb.mxu0 %v1592_v62  ;;  %v768_v62 = vld [vmem:[%s2264_s5 + $0x8] sm:$0xff] }
  0x37   :  { %648 = vmatpush.bf16.msrb.mxu1 %v1600_v63  ;;  %v767_v63 = vld [vmem:[%s2264_s5] sm:$0xff]  ;;  %s1700_s5 = smov 112  }
  0x38   :  { %661 = vmatpush.bf16.msrb.mxu2 %v1608_v0  ;;  %v725_v0 = vld [vmem:[%s2266_s7 + $0x2] ss:$0 sm:$0xff] }
  0x39   :  { %674 = vmatpush.bf16.msrb.mxu3 %v1616_v1 }
  0x3a   :  { %636 = vmatpush.bf16.msrb.mxu0 %v1591_v2 }
  0x3b   :  { %649 = vmatpush.bf16.msrb.mxu1 %v1599_v3 }
  0x3c   :  { %662 = vmatpush.bf16.msrb.mxu2 %v1607_v4 }
  0x3d   :  { %675 = vmatpush.bf16.msrb.mxu3 %v1615_v5 }
  0x3e   :  { %637 = vmatpush.bf16.msrb.mxu0 %v1590_v6 }
  0x3f   :  { %650 = vmatpush.bf16.msrb.mxu1 %v1598_v7 }
  0x40   :  { %663 = vmatpush.bf16.msrb.mxu2 %v1606_v8  ;;  %v1520_v8 = vld [vmem:[%s2265_s6 + $0x40] sm:$0xf] }
  0x41   :  { %676 = vmatpush.bf16.msrb.mxu3 %v1614_v9  ;;  %638 = vmatmul.bf16.vlgmr.msrb.gmra.mxu0 %v61_v14  ;;  %v1634_v9 = vld [vmem:[%s2265_s6 + $0x5c] sm:$0xf0] }
  0x42   :  { %651 = vmatmul.bf16.vlgmr.msrb.gmra.mxu1 %v62_v15  ;;  %706 = vmatpush.msra.mxu0 %v692_v18  ;;  %v1521_v10 = vor.u32 %v1634_v9, %v1520_v8  ;;  %v1631_v15 = vld [vmem:[%s2265_s6 + $0x4c] sm:$0xf] }
  0x43   :  { %664 = vmatmul.bf16.vlgmr.msrb.gmra.mxu2 %v63_v16  ;;  %742 = vmatpush.msra.mxu1 %v724_v32  ;;  %v1530_v16 = vld [vmem:[%s2265_s6 + $0x68] sm:$0xf0] }
  0x44   :  { %677 = vmatmul.bf16.vlgmr.msrb.gmra.mxu3 %v64_v17  ;;  %707 = vmatpush.msra.mxu0 %v691_v19  ;;  %v1630_v17 = vld [vmem:[%s2265_s6 + $0x44] sm:$0xf]  ;;  %v1533_v18 = vor.u32 %v1631_v15, %v1530_v16 }
  0x45   :  { %743 = vmatpush.msra.mxu1 %v723_v33  ;;  %788 = vmatpush.msra.mxu2 %v768_v62  ;;  %v1522_v19 = vld [vmem:[%s2265_s6 + $0x60] sm:$0xf0]  ;;  %v1496_v33 = vld [vmem:[%s2265_s6 + $0x8] sm:$0xf] }
  0x46   :  { %708 = vmatpush.msra.mxu0 %v690_v21  ;;  %924 = vmatpush.bf16.msra.mxu3 %v1521_v10  ;;  %v1635_v21 = vld [vmem:[%s2265_s6 + $0x64] sm:$0xf0] }
  0x47   :  { %744 = vmatpush.msra.mxu1 %v722_v36  ;;  %789 = vmatpush.msra.mxu2 %v767_v63  ;;  %v1633_v36 = vld [vmem:[%s2265_s6 + $0x5c] sm:$0xf] }
  0x48   :  { %709 = vmatpush.msra.mxu0 %v689_v22  ;;  %v1525_v22 = vor.u32 %v1630_v17, %v1522_v19 }
  0x49   :  { %745 = vmatpush.msra.mxu1 %v721_v56  ;;  %963 = vmatpush.bf16.msrb.mxu2 %v1533_v18  ;;  %v1512_v56 = vld [vmem:[%s2265_s6 + $0x18] sm:$0xf] }
  0x4a   :  { %710 = vmatpush.msra.mxu0 %v688_v24  ;;  %v1488_v24 = vld [vmem:[%s2265_s6] sm:$0xf] }
  0x4c   :  { %711 = vmatpush.msra.mxu0 %v687_v26  ;;  %v1623_v26 = vld [vmem:[%s2265_s6 + $0xc] sm:$0xf] }
  0x4e   :  { %712 = vmatpush.msra.mxu0 %v686_v29  ;;  %v1622_v29 = vld [vmem:[%s2265_s6 + $0x4] sm:$0xf] }
  0x50   :  { %713 = vmatpush.msra.mxu0 %v685_v31 }
  0x52   :  { %937 = vmatpush.bf16.msrb.mxu0 %v1525_v22 }
  0x9e   :  { %v587_v20 = vpop.f32.mrf.mxu0 }
  0x9f   :  { %v600_v23 = vpop.f32.mrf.mxu1  ;;  %v588_v38 = vadd.f32 %v587_v20, %v193_v34  ;;  %v1528_v20 = vld [vmem:[%s2265_s6 + $0x48] sm:$0xf] }
  0xa0   :  { %v1627_v34 = vld [vmem:[%s2265_s6 + $0x24] sm:$0xf0] }
  0xa1   :  { %v601_v39 = vadd.f32 %v600_v23, %v588_v38  ;;  %v1529_v23 = vor.u32 %v1635_v21, %v1528_v20  ;;  %v1536_v38 = vld [vmem:[%s2265_s6 + $0x50] sm:$0xf] }
  0xa3   :  { %950 = vmatpush.bf16.msrb.mxu1 %v1529_v23 }
  0xa6   :  { %v613_v25 = vpop.f32.mrf.mxu2  ;;  %v589_v28 = vpop.f32.mrf.mxu0 }
  0xa7   :  { %v626_v27 = vpop.f32.mrf.mxu3  ;;  %v602_v30 = vpop.f32.mrf.mxu1  ;;  %v614_v40 = vadd.f32 %v613_v25, %v601_v39  ;;  %v1626_v25 = vld [vmem:[%s2265_s6 + $0x1c] sm:$0xf0]  ;;  %v1498_v28 = vld [vmem:[%s2265_s6 + $0x28] sm:$0xf0] }
  0xa8   :  { %v1490_v30 = vld [vmem:[%s2265_s6 + $0x20] sm:$0xf0]  ;;  %v1501_v31 = vor.u32 %v1623_v26, %v1498_v28 }
  0xa9   :  { %v627_v41 = vadd.f32 %v626_v27, %v614_v40  ;;  %v1489_v27 = vor.u32 %v1626_v25, %v1488_v24  ;;  %v1493_v32 = vor.u32 %v1622_v29, %v1490_v30  ;;  %v1636_v40 = vld [vmem:[%s2265_s6 + $0x6c] sm:$0xf0] }
  0xaa   :  { %964 = vmatpush.bf16.msrb.mxu2 %v1501_v31 }
  0xab   :  { %925 = vmatpush.bf16.msra.mxu3 %v1489_v27  ;;  %938 = vmatpush.bf16.msrb.mxu0 %v1493_v32 }
  0xae   :  { %v615_v35 = vpop.f32.mrf.mxu2 }
  0xaf   :  { %v628_v37 = vpop.f32.mrf.mxu3  ;;  %v1497_v35 = vor.u32 %v1627_v34, %v1496_v33 }
  0xb0   :  { %v1546_v37 = vld [vmem:[%s2265_s6 + $0x78] sm:$0xf0] }
  0xb1   :  { %951 = vmatpush.bf16.msrb.mxu1 %v1497_v35  ;;  %v1549_v39 = vor.u32 %v1633_v36, %v1546_v37 }
  0xbe   :  { %v639_v42 = vpop.f32.mrf.mxu0 }
  0xbf   :  { %v652_v43 = vpop.f32.mrf.mxu1  ;;  %v640_v44 = vadd.f32 %v639_v42, %v627_v41  ;;  %v1632_v41 = vld [vmem:[%s2265_s6 + $0x54] sm:$0xf] }
  0xc0   :  { %v1538_v42 = vld [vmem:[%s2265_s6 + $0x70] sm:$0xf0] }
  0xc1   :  { %v653_v45 = vadd.f32 %v652_v43, %v640_v44  ;;  %v1537_v43 = vor.u32 %v1636_v40, %v1536_v38  ;;  %v1541_v44 = vor.u32 %v1632_v41, %v1538_v42 }
  0xc3   :  { %976 = vmatpush.bf16.msrb.mxu3 %v1537_v43 }
  0xc6   :  { %v665_v46 = vpop.f32.mrf.mxu2  ;;  %v641_v49 = vpop.f32.mrf.mxu0 }
  0xc7   :  { %v678_v47 = vpop.f32.mrf.mxu3  ;;  %v666_v48 = vadd.f32 %v665_v46, %v653_v45  ;;  %v654_v50 = vpop.f32.mrf.mxu1  ;;  %v1544_v45 = vld [vmem:[%s2265_s6 + $0x58] sm:$0xf]  ;;  %v1514_v49 = vld [vmem:[%s2265_s6 + $0x38] sm:$0xf0] }
  0xc8   :  { %v1637_v46 = vld [vmem:[%s2265_s6 + $0x74] sm:$0xf0]  ;;  %v1504_v50 = vld [vmem:[%s2265_s6 + $0x10] sm:$0xf] }
  0xc9   :  { %v679_v51 = vadd.f32 %v678_v47, %v666_v48  ;;  %v1625_v47 = vld [vmem:[%s2265_s6 + $0x1c] sm:$0xf]  ;;  %v1545_v48 = vor.u32 %v1637_v46, %v1544_v45 }
  0xcb   :  { %vm682_vm0 = vcmp.gt.f32.partialorder %v679_v51, 0.0  ;;  %v683_v52 = vmul.f32 0.2, %v679_v51 }
  0xcd   :  { %v684_v53 = vsel %vm682_vm0, %v679_v51, %v683_v52  ;;  %v1628_v51 = vld [vmem:[%s2265_s6 + $0x2c] sm:$0xf0]  ;;  %v1517_v52 = vor.u32 %v1625_v47, %v1514_v49 }
  0xce   :  { %v667_v54 = vpop.f32.mrf.mxu2  ;;  %1481 = vmatmul.msk.f32.vlgmr.msra.gmra.mxu0 %vm694_vm1, %v684_v53  ;;  %v1505_v53 = vor.u32 %v1628_v51, %v1504_v50 }
  0xcf   :  { %v680_v55 = vpop.f32.mrf.mxu3  ;;  %989 = vmatpush.bf16.msra.mxu0 %v1541_v44  ;;  %v1624_v54 = vld [vmem:[%s2265_s6 + $0x14] sm:$0xf] }
  0xd0   :  { %v1506_v55 = vld [vmem:[%s2265_s6 + $0x30] sm:$0xf0]  ;;  %977 = vmatpush.bf16.msrb.mxu3 %v1505_v53 }
 0x14b   :  { %v715_v58 = vpop.f32.mrf.mxu0 }
 0x14c   :  { %v716_v59 = vadd.f32 %v715_v58, %v693_v57  ;;  %v1509_v57 = vor.u32 %v1624_v54, %v1506_v55  ;;  %v1629_v58 = vld [vmem:[%s2265_s6 + $0x34] sm:$0xf0]  ;;  %s1701_s6 = smov [#allocation2]  }
 0x14d   :  { %s1208_s2 = sshll.u32 %s1701_s6, 4  ;;  %s1209_s2 = int_to_ptr.vmem [resolvable:$true] %s1208_s2 }
 0x14e   :  { %vm718_vm2 = vcmp.gt.f32.partialorder %v716_v59, 0.0  ;;  %v719_v60 = vmul.f32 0.2, %v716_v59  ;;  %990 = vmatpush.bf16.msra.mxu0 %v1509_v57 }
 0x150   :  { %v720_v61 = vsel %vm718_vm2, %v716_v59, %v719_v60  ;;  %v1513_v59 = vor.u32 %v1629_v58, %v1512_v56  ;;  %v769_v60 = vld [vmem:[%s2266_s7 + $0x3] ss:$0 sm:$0xff] }
 0x151   :  { %1482 = vmatmul.msk.f32.vlgmr.msra.gmra.mxu1 %vm726_vm3, %v720_v61 }
 0x152   :  { %1002 = vmatpush.bf16.msra.mxu1 %v1545_v48 }
 0x156   :  { %1003 = vmatpush.bf16.msra.mxu1 %v1513_v59 }
 0x1ce   :  { %v747_v1 = vpop.f32.mrf.mxu1 }
 0x1cf   :  { %v748_v2 = vadd.f32 %v747_v1, %v725_v0 }
 0x1d1   :  { %vm750_vm4 = vcmp.gt.f32.partialorder %v748_v2, 0.0  ;;  %v751_v3 = vmul.f32 0.2, %v748_v2 }
 0x1d3   :  { %v752_v4 = vsel %vm750_vm4, %v748_v2, %v751_v3  ;;  %v1484_v2 = vld [vmem:[%s2266_s7 + $0x4] ss:$8 sm:$0xf] }
 0x1d4   :  { %754 = vst.msk [vmem:[%s2267_s8] sm:$0x3] %vm753_vm5, %v752_v4  ;;  %v756_v5 = vmul.f32 0.5, %v752_v4  ;;  %v1485_v3 = vld [vmem:[%s2266_s7 + $0x4] ss:$8 sm:$0xf0] }
 0x1d6   :  { %v757_v6 = vmul.f32 1.442695, %v756_v5 }
 0x1d8   :  { %1640 = vpow2.f32 %v757_v6 }
 0x1de   :  { %v1641_v7 = vpop.eup %1640 }
 0x1df   :  { %760 = vrot.lane.b32.xlu0 %v1641_v7, %s1700_s5 }
 0x251   :  { %v761_v12 = vpop.permute.xlu0 %760 }
 0x252   :  { %v763_v13 = vmul.f32 %v761_v12, %v755_v11 }
 0x254   :  { %v764_v14 = vadd.f32 %v763_v13, %v752_v4  ;;  %v2129_v4 = vor.u32 %v1485_v3, %v1484_v2 }
 0x256   :  { %1483 = vmatmul.msk.f32.vlgmr.msra.gmra.mxu2 %vm770_vm6, %v764_v14  ;;  %766 = vst.msk [vmem:[#allocation2] sm:$0x3] %vm765_vm7, %v764_v14  ;;  %v820_v5 = vperm.slane %v2129_v4, 1  ;;  %v821_v6 = vperm.slane %v2129_v4, 2  ;;  %v819_v12 = vperm.slane %v2129_v4, 0  ;;  %v822_v14 = vperm.slane %v2129_v4, 3 }
 0x257   :  { %1015 = vmatpush.bf16.msra.mxu2 %v1549_v39  ;;  %1213 = dma.vmem_to_hbm [thread:$0]  %s1209_s2, 32, %s1211_s24, [#allocation3]   ;;  %v824_v31 = vperm.slane %v2129_v4, 5  ;;  %v825_v32 = vperm.slane %v2129_v4, 6  ;;  %v823_v46 = vperm.slane %v2129_v4, 4  ;;  %v826_v48 = vperm.slane %v2129_v4, 7 }
 0x25b   :  { %1016 = vmatpush.bf16.msra.mxu2 %v1517_v52 }
 0x2d9   :  { %v791_v61 = vpop.f32.mrf.mxu2 }
 0x2da   :  { %v792_v62 = vadd.f32 %v791_v61, %v769_v60 }
 0x2dc   :  { %vm794_vm8 = vcmp.gt.f32.partialorder %v792_v62, 0.0  ;;  %v795_v63 = vmul.f32 0.2, %v792_v62 }
 0x2de   :  { %v796_v0 = vsel %vm794_vm8, %v792_v62, %v795_v63 }
 0x2df   :  { %v797_v1 = vpack.c.bf16 %v796_v0, %v796_v0 }
 0x2e1   :  { %1550 = vmatmul.msk.bf16.vlgmr.msra.gmra.mxu3 %vm726_vm3, %v797_v1  ;;  %1551 = vmatmul.msk.bf16.vlgmr.msrb.gmra.mxu0 %vm726_vm3, %v797_v1 }
 0x2e2   :  { %1552 = vmatmul.msk.bf16.vlgmr.msrb.gmra.mxu1 %vm726_vm3, %v797_v1  ;;  %1553 = vmatmul.msk.bf16.vlgmr.msrb.gmra.mxu2 %vm726_vm3, %v797_v1 }
 0x2f1   :  { %1554 = vmatmul.msk.bf16.vlgmr.msrb.gmra.mxu3 %vm726_vm3, %v797_v1  ;;  %1555 = vmatmul.msk.bf16.vlgmr.msra.gmra.mxu0 %vm726_vm3, %v797_v1 }
 0x2f2   :  { %1556 = vmatmul.msk.bf16.vlgmr.msra.gmra.mxu1 %vm726_vm3, %v797_v1  ;;  %1557 = vmatmul.msk.bf16.vlgmr.msra.gmra.mxu2 %vm726_vm3, %v797_v1 }
 0x35e   :  { %v940_v7 = vpop.f32.mrf.mxu0 }
 0x35f   :  { %v941_v8 = vadd.f32 %v940_v7, %v820_v5  ;;  %v953_v9 = vpop.f32.mrf.mxu1 }
 0x360   :  { %v954_v10 = vadd.f32 %v953_v9, %v821_v6 }
 0x361   :  { %v1023_v11 = vsub.f32 0.0, %v941_v8 }
 0x362   :  { %v1024_v13 = vsub.f32 0.0, %v954_v10 }
 0x363   :  { %v1032_v15 = vmul.f32 1.442695, %v1023_v11 }
 0x364   :  { %v1034_v16 = vmul.f32 1.442695, %v1024_v13  ;;  %v927_v17 = vpop.f32.mrf.mxu3 }
 0x365   :  { %1642 = vpow2.f32 %v1032_v15  ;;  %v928_v18 = vadd.f32 %v927_v17, %v819_v12  ;;  %v966_v19 = vpop.f32.mrf.mxu2 }
 0x366   :  { %1644 = vpow2.f32 %v1034_v16  ;;  %v967_v20 = vadd.f32 %v966_v19, %v822_v14  ;;  %v942_v21 = vpop.f32.mrf.mxu0 }
 0x367   :  { %v1022_v22 = vsub.f32 0.0, %v928_v18  ;;  %v955_v23 = vpop.f32.mrf.mxu1 }
 0x368   :  { %v1025_v24 = vsub.f32 0.0, %v967_v20 }
 0x369   :  { %v1030_v25 = vmul.f32 1.442695, %v1022_v22 }
 0x36a   :  { %v1036_v26 = vmul.f32 1.442695, %v1025_v24 }
 0x36b   :  { %v1643_v27 = vpop.eup %1642  ;;  %1646 = vpow2.f32 %v1030_v25 }
 0x36c   :  { %v1645_v28 = vpop.eup %1644  ;;  %v2135_v29 = vadd.f32 1.0, %v1643_v27  ;;  %1648 = vpow2.f32 %v1036_v26  ;;  %v929_v30 = vpop.f32.mrf.mxu3 }
 0x36d   :  { %v2139_v33 = vadd.f32 1.0, %v1645_v28  ;;  %v968_v34 = vpop.f32.mrf.mxu2 }
 0x36e   :  { %1650 = vrcp.f32 %v2135_v29  ;;  %v992_v35 = vpop.f32.mrf.mxu0  ;;  %v1078_v51 = vand.u32 2147483647, %v2135_v29  ;;  %v1080_v52 = vand.u32 2147483648, %v2135_v29  ;;  %vm1074_vm9 = vweird.f32 %v2135_v29 }
 0x36f   :  { %1652 = vrcp.f32 %v2139_v33  ;;  %v1005_v36 = vpop.f32.mrf.mxu1  ;;  %v993_v37 = vadd.f32 %v992_v35, %v824_v31  ;;  %v1093_v55 = vand.u32 2147483647, %v2139_v33  ;;  %vm1089_vm10 = vweird.f32 %v2139_v33 }
 0x370   :  { %v1006_v38 = vadd.f32 %v1005_v36, %v825_v32  ;;  %v1095_v58 = vand.u32 2147483648, %v2139_v33  ;;  %vm2166_vm11 = vcmp.eq.f32.partialorder %v1078_v51, 8.507059e+37  ;;  %v1081_v3 = vor.u32 1.1754944e-38, %v1080_v52 }
 0x371   :  { %v1647_v39 = vpop.eup %1646  ;;  %v1027_v43 = vsub.f32 0.0, %v993_v37  ;;  %vm2171_vm12 = vcmp.eq.f32.partialorder %v1093_v55, 8.507059e+37 }
 0x372   :  { %v1649_v40 = vpop.eup %1648  ;;  %v2143_v41 = vadd.f32 1.0, %v1647_v39  ;;  %v1028_v45 = vsub.f32 0.0, %v1006_v38  ;;  %v1096_v11 = vor.u32 1.1754944e-38, %v1095_v58 }
 0x373   :  { %v2145_v42 = vadd.f32 1.0, %v1649_v40  ;;  %v1040_v59 = vmul.f32 1.442695, %v1027_v43 }
 0x374   :  { %v2147_v44 = vpop.eup %1650  ;;  %1654 = vrcp.f32 %v2143_v41  ;;  %v979_v47 = vpop.f32.mrf.mxu3  ;;  %v1042_v62 = vmul.f32 1.442695, %v1028_v45  ;;  %v1063_v18 = vand.u32 2147483647, %v2143_v41  ;;  %v1065_v19 = vand.u32 2147483648, %v2143_v41 }
 0x375   :  { %v2152_v49 = vpop.eup %1652  ;;  %v1070_v50 = vmul.f32 %v2147_v44, %v2135_v29  ;;  %1656 = vrcp.f32 %v2145_v42  ;;  %v1018_v53 = vpop.f32.mrf.mxu2  ;;  %v980_v63 = vadd.f32 %v979_v47, %v823_v46  ;;  %vm1075_vm13 = vweird.f32 %v2147_v44 }
 0x376   :  { %v1085_v54 = vmul.f32 %v2152_v49, %v2139_v33  ;;  %v994_v56 = vpop.f32.mrf.mxu0  ;;  %v1019_v0 = vadd.f32 %v1018_v53, %v826_v48  ;;  %1658 = vpow2.f32 %v1040_v59  ;;  %vm1090_vm14 = vweird.f32 %v2152_v49  ;;  %vm2185_vm0 = vmor %vm1074_vm9, %vm1075_vm13 }
 0x377   :  { %v1071_v57 = vsub.f32 1.0, %v1070_v50  ;;  %v1007_v60 = vpop.f32.mrf.mxu1  ;;  %1660 = vpow2.f32 %v1042_v62  ;;  %v1026_v7 = vsub.f32 0.0, %v980_v63  ;;  %v1108_v24 = vand.u32 2147483647, %v2145_v42  ;;  %vm2198_vm1 = vmor %vm1089_vm10, %vm1090_vm14 }
 0x378   :  { %v1086_v61 = vsub.f32 1.0, %v1085_v54  ;;  %v1029_v8 = vsub.f32 0.0, %v1019_v0  ;;  %v1110_v25 = vand.u32 2147483648, %v2145_v42  ;;  %vm1059_vm4 = vweird.f32 %v2143_v41 }
 0x379   :  { %v1072_v1 = vmul.f32 %v2147_v44, %v1071_v57  ;;  %v1038_v15 = vmul.f32 1.442695, %v1026_v7  ;;  %vm1104_vm5 = vweird.f32 %v2145_v42  ;;  %v1066_v38 = vor.u32 1.1754944e-38, %v1065_v19 }
 0x37a   :  { %v1655_v4 = vpop.eup %1654  ;;  %v1087_v5 = vmul.f32 %v2152_v49, %v1086_v61  ;;  %v1044_v20 = vmul.f32 1.442695, %v1029_v8  ;;  %vm1064_vm8 = vcmp.eq.f32.partialorder %v1063_v18, 8.507059e+37  ;;  %vm1109_vm9 = vcmp.eq.f32.partialorder %v1108_v24, 8.507059e+37 }
 0x37b   :  { %v1657_v9 = vpop.eup %1656  ;;  %v1073_v10 = vadd.f32 %v2147_v44, %v1072_v1  ;;  %v1055_v12 = vmul.f32 %v1655_v4, %v2143_v41  ;;  %1662 = vpow2.f32 %v1038_v15  ;;  %vm1060_vm2 = vweird.f32 %v1655_v4 }
 0x37c   :  { %v1088_v13 = vadd.f32 %v2152_v49, %v1087_v5  ;;  %v1100_v14 = vmul.f32 %v1657_v9, %v2145_v42  ;;  %v981_v16 = vpop.f32.mrf.mxu3  ;;  %v1659_v26 = vpop.eup %1658  ;;  %1664 = vpow2.f32 %v1044_v20  ;;  %vm1105_vm3 = vweird.f32 %v1657_v9  ;;  %vm2213_vm6 = vmor %vm1059_vm4, %vm1060_vm2 }
 0x37d   :  { %v1056_v17 = vsub.f32 1.0, %v1055_v12  ;;  %v1020_v21 = vpop.f32.mrf.mxu2  ;;  %v1077_v27 = vsel %vm2185_vm0, %v2147_v44, %v1073_v10  ;;  %v1661_v30 = vpop.eup %1660  ;;  %v2205_v34 = vadd.f32 1.0, %v1659_v26  ;;  %vm1106_vm7 = vmor %vm1104_vm5, %vm1105_vm3  ;;  %v1111_v42 = vor.u32 1.1754944e-38, %v1110_v25 }
 0x37e   :  { %v1101_v23 = vsub.f32 1.0, %v1100_v14  ;;  %v1092_v31 = vsel %vm2198_vm1, %v2152_v49, %v1088_v13  ;;  %v2209_v33 = vadd.f32 1.0, %v1661_v30  ;;  %v1082_v36 = vsel %vm2166_vm11, %v1081_v3, %v1077_v27 }
 0x37f   :  { %v1057_v29 = vmul.f32 %v1655_v4, %v1056_v17  ;;  %1666 = vrcp.f32 %v2205_v34  ;;  %v1097_v40 = vsel %vm2171_vm12, %v1096_v11, %v1092_v31  ;;  %vm1190_vm10 = vcmask 1045508  }
 0x380   :  { %v1102_v32 = vmul.f32 %v1657_v9, %v1101_v23  ;;  %1668 = vrcp.f32 %v2209_v33  ;;  %v1182_v46 = vrot.slane %v1082_v36, 6  ;;  %vm1192_vm11 = vcmask 1043456  }
 0x381   :  { %v1058_v35 = vadd.f32 %v1655_v4, %v1057_v29  ;;  %v1663_v43 = vpop.eup %1662  ;;  %v1183_v49 = vrot.slane %v1097_v40, 4  ;;  %vm1134_vm12 = vweird.f32 %v2205_v34  ;;  %v1140_v5 = vand.u32 2147483648, %v2205_v34 }
 0x382   :  { %v1103_v39 = vadd.f32 %v1657_v9, %v1102_v32  ;;  %v1665_v45 = vpop.eup %1664  ;;  %v1050_v51 = vadd.f32 1.0, %v1663_v43  ;;  %vm1149_vm0 = vweird.f32 %v2209_v33  ;;  %v1155_v10 = vand.u32 2147483648, %v2209_v33 }
 0x383   :  { %v1062_v41 = vsel %vm2213_vm6, %v1655_v4, %v1058_v35  ;;  %v1053_v52 = vadd.f32 1.0, %v1665_v45  ;;  %v1138_v4 = vand.u32 2147483647, %v2205_v34  ;;  %v1141_v23 = vor.u32 1.1754944e-38, %v1140_v5 }
 0x384   :  { %v1107_v44 = vsel %vm1106_vm7, %v1657_v9, %v1103_v39  ;;  %v1067_v47 = vsel %vm1064_vm8, %v1066_v38, %v1062_v41  ;;  %1670 = vrcp.f32 %v1050_v51  ;;  %v1153_v9 = vand.u32 2147483647, %v2209_v33 }
 0x385   :  { %v1112_v48 = vsel %vm1109_vm9, %v1111_v42, %v1107_v44  ;;  %v1667_v53 = vpop.eup %1666  ;;  %v1189_v54 = vsel %vm1188_vm15, %v1067_v47, %v1182_v46  ;;  %1672 = vrcp.f32 %v1053_v52  ;;  %vm1119_vm1 = vweird.f32 %v1050_v51 }
 0x386   :  { %v1184_v50 = vrot.slane %v1112_v48, 2  ;;  %v1669_v56 = vpop.eup %1668  ;;  %v1130_v58 = vmul.f32 %v1667_v53, %v2205_v34  ;;  %vm1135_vm13 = vweird.f32 %v1667_v53  ;;  %v1123_v13 = vand.u32 2147483647, %v1050_v51 }
 0x387   :  { %v1145_v59 = vmul.f32 %v1669_v56, %v2209_v33  ;;  %vm1150_vm14 = vweird.f32 %v1669_v56  ;;  %vm2239_vm2 = vmor %vm1134_vm12, %vm1135_vm13  ;;  %v1125_v17 = vand.u32 2147483648, %v1050_v51  ;;  %v1168_v18 = vand.u32 2147483647, %v1053_v52 }
 0x388   :  { %v1191_v55 = vsel %vm1190_vm10, %v1183_v49, %v1184_v50  ;;  %v1131_v60 = vsub.f32 1.0, %v1130_v58  ;;  %vm2245_vm4 = vmor %vm1149_vm0, %vm1150_vm14  ;;  %v1170_v19 = vand.u32 2147483648, %v1053_v52  ;;  %vm1139_vm6 = vcmp.eq.f32.partialorder %v1138_v4, 8.507059e+37 }
 0x389   :  { %v1193_v57 = vsel %vm1192_vm11, %v1189_v54, %v1191_v55  ;;  %v1146_v61 = vsub.f32 1.0, %v1145_v59  ;;  %v1156_v24 = vor.u32 1.1754944e-38, %v1155_v10  ;;  %vm1154_vm8 = vcmp.eq.f32.partialorder %v1153_v9, 8.507059e+37 }
 0x38a   :  { %1199 = vst [vmem:[%s2269_s10] sm:$0xff] %v1193_v57  ;;  %v1132_v62 = vmul.f32 %v1667_v53, %v1131_v60  ;;  %v1671_v63 = vpop.eup %1670  ;;  %vm1164_vm9 = vweird.f32 %v1053_v52  ;;  %v1126_v29 = vor.u32 1.1754944e-38, %v1125_v17  ;;  %v1171_v30 = vor.u32 1.1754944e-38, %v1170_v19 }
 0x38b   :  { %v1147_v0 = vmul.f32 %v1669_v56, %v1146_v61  ;;  %v1115_v1 = vmul.f32 %v1671_v63, %v1050_v51  ;;  %v1673_v2 = vpop.eup %1672  ;;  %vm1120_vm3 = vweird.f32 %v1671_v63  ;;  %vm1124_vm13 = vcmp.eq.f32.partialorder %v1123_v13, 8.507059e+37 }
 0x38c   :  { %v1133_v3 = vadd.f32 %v1667_v53, %v1132_v62  ;;  %v1160_v8 = vmul.f32 %v1673_v2, %v1053_v52  ;;  %vm1165_vm5 = vweird.f32 %v1673_v2  ;;  %vm1121_vm7 = vmor %vm1119_vm1, %vm1120_vm3  ;;  %vm1169_vm14 = vcmp.eq.f32.partialorder %v1168_v18, 8.507059e+37 }
 0x38d   :  { %v1148_v6 = vadd.f32 %v1669_v56, %v1147_v0  ;;  %v1116_v7 = vsub.f32 1.0, %v1115_v1  ;;  %vm1166_vm12 = vmor %vm1164_vm9, %vm1165_vm5 }
 0x38e   :  { %v1161_v14 = vsub.f32 1.0, %v1160_v8  ;;  %v1137_v15 = vsel %vm2239_vm2, %v1667_v53, %v1133_v3 }
 0x38f   :  { %v1117_v12 = vmul.f32 %v1671_v63, %v1116_v7  ;;  %v1152_v20 = vsel %vm2245_vm4, %v1669_v56, %v1148_v6  ;;  %v1142_v27 = vsel %vm1139_vm6, %v1141_v23, %v1137_v15 }
 0x390   :  { %v1162_v22 = vmul.f32 %v1673_v2, %v1161_v14  ;;  %v1157_v28 = vsel %vm1154_vm8, %v1156_v24, %v1152_v20  ;;  %v1185_v35 = vrot.slane %v1142_v27, 6 }
 0x391   :  { %v1118_v21 = vadd.f32 %v1671_v63, %v1117_v12  ;;  %v1186_v33 = vrot.slane %v1157_v28, 4 }
 0x392   :  { %v1163_v26 = vadd.f32 %v1673_v2, %v1162_v22 }
 0x393   :  { %v1122_v25 = vsel %vm1121_vm7, %v1671_v63, %v1118_v21 }
 0x394   :  { %v1167_v31 = vsel %vm1166_vm12, %v1673_v2, %v1163_v26  ;;  %v1127_v32 = vsel %vm1124_vm13, %v1126_v29, %v1122_v25 }
 0x395   :  { %v1172_v34 = vsel %vm1169_vm14, %v1171_v30, %v1167_v31  ;;  %v1194_v37 = vsel %vm1188_vm15, %v1127_v32, %v1185_v35 }
 0x396   :  { %v1187_v36 = vrot.slane %v1172_v34, 2 }
 0x398   :  { %v1195_v38 = vsel %vm1190_vm10, %v1186_v33, %v1187_v36 }
 0x399   :  { %v1196_v39 = vsel %vm1192_vm11, %v1194_v37, %v1195_v38 }
 0x39a   :  { %1200 = vst [vmem:[%s2269_s10 + $0x8] sm:$0xff] %v1196_v39 }
 0x39b   :  { %1698 = dma.done.wait [#allocation3], 32  }
 0x39c   :  { %1699 = vsyncadd [#allocation3], 4294967264 }
 0x39d   :  { %1224 = vsyncpa [#allocation3], 1 }

</bundles_post_ra>
